<compile_context>
chip_gen: v6e
topology: v6e:2x2x1
jax: 0.10.0
libtpu: 0.0.40
codegen_flags: <defaults>
</compile_context>

<pallas_src>
import functools

import jax
import jax.numpy as jnp
import numpy as np
from jax.experimental import pallas as pl
from jax.experimental.pallas import tpu as pltpu


# ----------------------------------------------------------------------------
# Kernels
# ----------------------------------------------------------------------------
def _apply_act(y, act):
    if act == "leaky":
        return jnp.where(y > 0, y, 0.2 * y)
    if act == "relu":
        return jnp.maximum(y, 0.0)
    if act == "tanh":
        return jnp.tanh(y)
    return y  # "none"


def _tap_conv_kernel(z_ref, w_ref, shift_ref, o_ref, *, taps, wo, act, flat_out):
    """out[r, q, :] = act( sum_t  z[r, q+t, :] @ w[t]  + shift ).

    When flat_out, the (wo, Nout) tail is stored as one lane-dense wo*Nout axis
    and the f32 epilogue runs on the dense layout."""
    rb, _, kc = z_ref.shape
    nout = w_ref.shape[2]
    acc = jnp.zeros((rb * wo, nout), jnp.float32)
    for t in range(taps):  # static unroll (taps in {2, 3})
        xt = z_ref[:, t:t + wo, :].reshape(rb * wo, kc)
        acc = acc + jnp.dot(xt, w_ref[t], preferred_element_type=jnp.float32)
    if flat_out:
        acc = acc.reshape(rb, wo * nout)          # lane-dense (wo*nout % 128 == 0)
    else:
        acc = acc.reshape(rb, wo, nout)
    y = _apply_act(acc + shift_ref[...], act)     # f32 epilogue on dense vregs
    o_ref[...] = y.astype(o_ref.dtype)


def _matmul_kernel(x_ref, w_ref, shift_ref, o_ref, *, act):
    y = jnp.dot(x_ref[...], w_ref[...], preferred_element_type=jnp.float32)
    y = _apply_act(y + shift_ref[...], act)
    o_ref[...] = y.astype(o_ref.dtype)


# ----------------------------------------------------------------------------
# Pallas call wrappers
# ----------------------------------------------------------------------------
_TAP_KERNEL_OK = [None]  # None = unknown (lazy probe), True/False afterwards


def _fused_matmul(x, w, shift2, act, out_dtype, *, tm_max=4096):
    """out = act(x @ w + shift).  K and N kept at true extents; only M tiled."""
    M, K = x.shape
    Nout = w.shape[1]
    tm = tm_max if M >= tm_max else max(8, ((M + 7) // 8) * 8)
    Mp = ((M + tm - 1) // tm) * tm
    xp = jnp.pad(x, ((0, Mp - M), (0, 0))) if Mp != M else x
    out = pl.pallas_call(
        functools.partial(_matmul_kernel, act=act),
        out_shape=jax.ShapeDtypeStruct((Mp, Nout), out_dtype),
        grid_spec=pltpu.PrefetchScalarGridSpec(
            num_scalar_prefetch=0,
            grid=(Mp // tm,),
            in_specs=[
                pl.BlockSpec((tm, K), lambda i: (i, 0)),
                pl.BlockSpec((K, Nout), lambda i: (0, 0)),
                pl.BlockSpec((1, Nout), lambda i: (0, 0)),
            ],
            out_specs=pl.BlockSpec((tm, Nout), lambda i: (i, 0)),
        ),
        compiler_params=pltpu.CompilerParams(dimension_semantics=("parallel",)),
    )(xp, w, shift2)
    return out[:M]


def _pick_rb(R, wo, Wz, Kc, Nout, z_itemsize, *, target_m=8192,
             vmem_budget=12 << 20):
    """Rows-per-step for the tap kernel: big blocks (amortise the ~0.35us/step
    pipeline overhead), an EVEN number of grid steps (v7x: 2 TensorCores), and
    a conservative per-step VMEM estimate (lane padding of narrow channels
    included) that stays well below the 32 MiB default scoped limit."""
    rup = lambda x, m: -(-x // m) * m
    per_row = (rup(Wz, 8) * rup(Kc, 128) * z_itemsize * 2   # double-buffered z block
               + wo * rup(Nout, 128) * 4 * 2                # f32 matmul result + acc
               + wo * rup(Kc, 128) * z_itemsize)            # per-tap relayout temp
    rb = min(R, max(8, target_m // max(wo, 1)))
    rb = min(rb, max(8, vmem_budget // per_row))
    steps = max(2, -(-R // max(rb, 1)))
    if steps % 2:
        steps += 1                                          # even split over 2 TCs
    return max(8, rup(-(-R // steps), 8))


def _tap_conv_call(z, w_taps, shift, act, out_dtype, rb):
    """The big-path pallas_call.  z: (R, Wz, Kc); w_taps: (T, Kc, Nout)."""
    R, Wz, Kc = z.shape
    T, _, Nout = w_taps.shape
    wo = Wz - T + 1
    # Lane-dense output: flatten (wo, Nout) when Nout alone is not lane-dense.
    flat = (Nout % 128 != 0) and ((wo * Nout) % 128 == 0)
    Rp = -(-R // rb) * rb
    zp = jnp.pad(z, ((0, Rp - R), (0, 0), (0, 0))) if Rp != R else z
    if flat:
        shift_in = jnp.tile(shift.astype(jnp.float32), wo).reshape(1, wo * Nout)
        out_shape = jax.ShapeDtypeStruct((Rp, wo * Nout), out_dtype)
        out_spec = pl.BlockSpec((rb, wo * Nout), lambda i: (i, 0))
        shift_spec = pl.BlockSpec((1, wo * Nout), lambda i: (0, 0))
    else:
        shift_in = shift.astype(jnp.float32).reshape(1, Nout)
        out_shape = jax.ShapeDtypeStruct((Rp, wo, Nout), out_dtype)
        out_spec = pl.BlockSpec((rb, wo, Nout), lambda i: (i, 0, 0))
        shift_spec = pl.BlockSpec((1, Nout), lambda i: (0, 0))
    out = pl.pallas_call(
        functools.partial(_tap_conv_kernel, taps=T, wo=wo, act=act, flat_out=flat),
        out_shape=out_shape,
        grid_spec=pltpu.PrefetchScalarGridSpec(
            num_scalar_prefetch=0,
            grid=(Rp // rb,),
            in_specs=[
                pl.BlockSpec((rb, Wz, Kc), lambda i: (i, 0, 0)),
                pl.BlockSpec((T, Kc, Nout), lambda i: (0, 0, 0)),
                shift_spec,
            ],
            out_specs=out_spec,
        ),
        compiler_params=pltpu.CompilerParams(dimension_semantics=("parallel",)),
    )(zp, w_taps, shift_in)
    out = out[:R]
    return out.reshape(R, wo, Nout) if flat else out


def _tap_path_ok():
    """Lazy probe (also when imported as a library): exercise the tap kernel in
    both streamed dtypes; on any failure fall back to fused matmul everywhere."""
    if _TAP_KERNEL_OK[0] is None:
        try:
            for dt in (jnp.bfloat16, jnp.float32):
                z = jnp.ones((16, 33, 32), dt)
                w = jnp.full((2, 32, 8), 0.01, dt)
                s = jnp.zeros((8,), jnp.float32)
                jax.block_until_ready(_tap_conv_call(z, w, s, "leaky", dt, 8))
            _TAP_KERNEL_OK[0] = True
        except Exception as e:  # pragma: no cover - safety net
            print("NOTE: tap-conv kernel unavailable; using fused-matmul fallback:",
                  repr(e))
            _TAP_KERNEL_OK[0] = False
    return _TAP_KERNEL_OK[0]


def _tap_conv(z, w_taps, shift, act, out_dtype, *, target_m=8192):
    """z: (R, Wz, Kc); w_taps: (T, Kc, Nout).  Returns (R, Wo, Nout) with
    Wo = Wz - T + 1 and out[r, q] = act(sum_t z[r, q + t] @ w_taps[t] + shift)."""
    R, Wz, Kc = z.shape
    T, _, Nout = w_taps.shape
    wo = Wz - T + 1

    big = _tap_path_ok() and (wo % 32 == 0) and (R >= 16) and (R * wo >= 1024)
    if big:
        rb = _pick_rb(R, wo, Wz, Kc, Nout, z.dtype.itemsize, target_m=target_m)
        return _tap_conv_call(z, w_taps, shift, act, out_dtype, rb)

    # Small / fallback path: fold the column taps on the host (tensors are tiny
    # here) and run a single fused matmul kernel.
    patches = jnp.concatenate([z[:, t:t + wo, :] for t in range(T)], axis=-1)
    patches = patches.reshape(R * wo, T * Kc)
    shift2 = shift.reshape(1, Nout).astype(jnp.float32)
    out = _fused_matmul(patches, w_taps.reshape(T * Kc, Nout), shift2, act, out_dtype)
    return out.reshape(R, wo, Nout)


# ----------------------------------------------------------------------------
# Conv (down) and ConvTranspose (up) lowered to row-folded z + tap kernel
# ----------------------------------------------------------------------------
def _build_z_down(x, pad_mode):
    """x: (N, H, W, C) -> z: (N*Ho, Wo+1, 8C) with
    z[n*Ho + ho, j, (kh*2 + b)*C + c] = xpad[n, 2*ho + kh, 2*j + b, c]."""
    pm = "reflect" if pad_mode == "reflect" else "constant"
    xp = jnp.pad(x, ((0, 0), (1, 1), (1, 1), (0, 0)), mode=pm)
    N, Hp, Wp, C = xp.shape
    Ho, Wo = (Hp - 4) // 2 + 1, (Wp - 4) // 2 + 1
    cols = []
    for kh in range(4):
        for b in range(2):
            cols.append(xp[:, kh:kh + 2 * Ho:2, b:b + 2 * (Wo + 1):2, :])
    z = jnp.concatenate(cols, axis=-1)
    return z.reshape(N * Ho, Wo + 1, 8 * C), Ho, Wo


def _down_tap_weights(w_oihw, scale, dtype):
    """(O, C, 4, 4) Conv2d weight -> per-column-tap (2, 8C, O); BN scale folded."""
    O, C = w_oihw.shape[:2]
    w = jnp.transpose(w_oihw, (2, 3, 1, 0))      # (kh, kw, c, o)
    w = w.reshape(4, 2, 2, C, O)                 # (kh, dw, b, c, o); kw = 2*dw + b
    w = jnp.transpose(w, (1, 0, 2, 3, 4)).reshape(2, 8 * C, O)
    return (w * scale[None, None, :]).astype(dtype)


def conv_down(x, w_oihw, scale, shift, act, pad_mode,
              compute_dtype=jnp.bfloat16, out_dtype=None):
    """Conv2d(k=4, s=2, p=1) (+ folded eval BN) + activation.  x: NHWC."""
    if out_dtype is None:
        out_dtype = compute_dtype
    N = x.shape[0]
    O = w_oihw.shape[0]
    z, Ho, Wo = _build_z_down(x.astype(compute_dtype), pad_mode)
    y = _tap_conv(z, _down_tap_weights(w_oihw, scale, compute_dtype),
                  shift, act, out_dtype)
    return y.reshape(N, Ho, Wo, O)


def _build_z_up(x):
    """x: (N, H, W, C) -> z: (N*H, W+2, 3C) with
    z[n*H + p, j, r*C + c] = xpad[n, p + r, j, c]  (zero pad of 1)."""
    xp = jnp.pad(x, ((0, 0), (1, 1), (1, 1), (0, 0)))
    N, H2, W2, C = xp.shape
    H, W = H2 - 2, W2 - 2
    z = jnp.concatenate([xp[:, r:r + H, :, :] for r in range(3)], axis=-1)
    return z.reshape(N * H, W + 2, 3 * C), H, W


def _up_tap_weights(w_iohw, scale, dtype):
    """(Cin, Cout, 4, 4) ConvTranspose2d weight -> per-column-tap (3, 3C, 4O)
    producing the 4 output phases (a, b) as channel blocks; BN scale folded."""
    C, O = w_iohw.shape[:2]
    wt = jnp.zeros((3, 3 * C, 4 * O), jnp.float32)
    for t in range(3):
        for r in range(3):
            for a in range(2):
                for b in range(2):
                    kh = a - 2 * r + 3
                    kw = b - 2 * t + 3
                    if 0 <= kh < 4 and 0 <= kw < 4:
                        wt = wt.at[t, r * C:(r + 1) * C,
                                   (a * 2 + b) * O:(a * 2 + b + 1) * O
                                   ].set(w_iohw[:, :, kh, kw])
    scale4 = jnp.tile(scale, 4)
    return (wt * scale4[None, None, :]).astype(dtype)


def conv_up(x, w_iohw, scale, shift, act,
            compute_dtype=jnp.bfloat16, out_dtype=None):
    """ConvTranspose2d(k=4, s=2, p=1) (+ folded eval BN) + activation via the
    4-phase decomposition.  x: NHWC."""
    if out_dtype is None:
        out_dtype = compute_dtype
    N = x.shape[0]
    O = w_iohw.shape[1]
    z, H, W = _build_z_up(x.astype(compute_dtype))
    y4 = _tap_conv(z, _up_tap_weights(w_iohw, scale, compute_dtype),
                   jnp.tile(shift, 4), act, out_dtype)       # (N*H, W, 4O)
    y = y4.reshape(N, H, W, 2, 2, O)
    # TODO(synk): emit phase-major output and let the next layer's z-build consume
    # it directly to remove this per-up-layer interleave transpose.
    return jnp.transpose(y, (0, 1, 3, 2, 4, 5)).reshape(N, 2 * H, 2 * W, O)


def _fold_bn(bias, gamma, beta, rmean, rvar, eps=1e-5):
    scale = gamma / jnp.sqrt(rvar + eps)
    shift = beta + (bias - rmean) * scale
    return scale, shift


# ----------------------------------------------------------------------------
# Parameter init (deterministic, synthetic, PyTorch layouts)
# ----------------------------------------------------------------------------
def init_params(key, in_ch=3, f=4):
    P = {}

    def nxt():
        nonlocal key
        key, sub = jax.random.split(key)
        return sub

    def add(name, cin, cout, transpose=False, bn=True):
        shape = (cin, cout, 4, 4) if transpose else (cout, cin, 4, 4)
        P[name + "_w"] = 0.05 * jax.random.normal(nxt(), shape, jnp.float32)
        P[name + "_b"] = 0.05 * jax.random.normal(nxt(), (cout,), jnp.float32)
        if bn:
            P[name + "_g"] = 1.0 + 0.05 * jax.random.normal(nxt(), (cout,), jnp.float32)
            P[name + "_be"] = 0.05 * jax.random.normal(nxt(), (cout,), jnp.float32)
            P[name + "_rm"] = 0.05 * jax.random.normal(nxt(), (cout,), jnp.float32)
            P[name + "_rv"] = jnp.abs(
                1.0 + 0.05 * jax.random.normal(nxt(), (cout,), jnp.float32))

    add("conv", in_ch, f, bn=False)
    add("down1", f, 2 * f)
    add("down2", 2 * f, 4 * f)
    add("down3", 4 * f, 8 * f)
    add("down4", 8 * f, 8 * f)
    add("down5", 8 * f, 8 * f)
    add("down6", 8 * f, 8 * f)
    add("bottleneck", 8 * f, 8 * f, bn=False)
    add("up1", 8 * f, 8 * f, transpose=True)
    add("up2", 16 * f, 8 * f, transpose=True)
    add("up3", 16 * f, 8 * f, transpose=True)
    add("up4", 16 * f, 8 * f, transpose=True)
    add("up5", 16 * f, 4 * f, transpose=True)
    add("up6", 8 * f, 2 * f, transpose=True)
    add("up7", 4 * f, f, transpose=True)
    add("up", 2 * f, in_ch, transpose=True, bn=False)
    return P


# ----------------------------------------------------------------------------
# Generator forward
# ----------------------------------------------------------------------------
def generator_forward(x_nchw, P, compute_dtype=jnp.bfloat16):
    # Intermediate activations / skips are kept in compute_dtype (bf16) end to
    # end — the net is HBM-bandwidth bound; only the final output is f32.
    x = jnp.transpose(x_nchw, (0, 2, 3, 1)).astype(compute_dtype)  # NCHW -> NHWC

    def scale_shift(name, bn):
        b = P[name + "_b"]
        if not bn:
            return jnp.ones_like(b), b
        return _fold_bn(b, P[name + "_g"], P[name + "_be"],
                        P[name + "_rm"], P[name + "_rv"])

    def down(h, name, act, pad_mode, bn=True):
        s, sh = scale_shift(name, bn)
        return conv_down(h, P[name + "_w"], s, sh, act, pad_mode, compute_dtype)

    def up(h, name, act="relu", bn=True, out_dtype=None):
        # Dropout(0.5) of CNNBlock is identity in eval mode.
        s, sh = scale_shift(name, bn)
        return conv_up(h, P[name + "_w"], s, sh, act, compute_dtype, out_dtype)

    d = down(x, "conv", "leaky", "reflect", bn=False)    # self.conv + LeakyReLU(0.2)
    d1 = down(d, "down1", "leaky", "reflect")
    d2 = down(d1, "down2", "leaky", "reflect")
    d3 = down(d2, "down3", "leaky", "reflect")
    d4 = down(d3, "down4", "leaky", "reflect")
    d5 = down(d4, "down5", "leaky", "reflect")
    d6 = down(d5, "down6", "leaky", "reflect")
    bott = down(d6, "bottleneck", "relu", "zeros", bn=False)
    u1 = up(bott, "up1")
    u2 = up(jnp.concatenate([u1, d6], axis=-1), "up2")
    u3 = up(jnp.concatenate([u2, d5], axis=-1), "up3")
    u4 = up(jnp.concatenate([u3, d4], axis=-1), "up4")
    u5 = up(jnp.concatenate([u4, d3], axis=-1), "up5")
    u6 = up(jnp.concatenate([u5, d2], axis=-1), "up6")
    u7 = up(jnp.concatenate([u6, d1], axis=-1), "up7")
    # Final ConvTranspose; self.tan (Tanh) is defined but NOT applied in the
    # reference forward, so no activation here.  Final output in f32.
    out = up(jnp.concatenate([u7, d], axis=-1), "up", act="none", bn=False,
             out_dtype=jnp.float32)
    return jnp.transpose(out, (0, 3, 1, 2))  # NHWC -> NCHW


# ----------------------------------------------------------------------------
# Numerical self-test against lax convolutions
# ----------------------------------------------------------------------------
def _ref_conv_down(x, w_oihw, bias, pad_mode):
    pm = "reflect" if pad_mode == "reflect" else "constant"
    xp = jnp.pad(x, ((0, 0), (1, 1), (1, 1), (0, 0)), mode=pm)
    w = jnp.transpose(w_oihw, (2, 3, 1, 0))
    y = jax.lax.conv_general_dilated(
        xp, w, window_strides=(2, 2), padding="VALID",
        dimension_numbers=("NHWC", "HWIO", "NHWC"),
        precision=jax.lax.Precision.HIGHEST)
    return y + bias


def _ref_conv_up(x, w_iohw, bias):
    w = jnp.transpose(w_iohw[:, :, ::-1, ::-1], (2, 3, 0, 1))
    y = jax.lax.conv_general_dilated(
        x, w, window_strides=(1, 1), padding=((2, 2), (2, 2)),
        lhs_dilation=(2, 2), dimension_numbers=("NHWC", "HWIO", "NHWC"),
        precision=jax.lax.Precision.HIGHEST)
    return y + bias


def _self_test(key):
    cases = [
        ("down-big", (1, 64, 64, 3), 8, False, "reflect"),
        ("down-small", (1, 8, 8, 16), 32, False, "zeros"),
        ("up-big", (1, 32, 32, 8), 16, True, None),
        ("up-small", (1, 4, 4, 8), 16, True, None),
    ]
    ks = jax.random.split(key, len(cases))
    for k, (name, xs, o, is_up, pad_mode) in zip(ks, cases):
        k1, k2, k3 = jax.random.split(k, 3)
        x = jax.random.normal(k1, xs, jnp.float32)
        c = xs[-1]
        w = 0.1 * jax.random.normal(k2, (c, o, 4, 4) if is_up else (o, c, 4, 4),
                                    jnp.float32)
        b = 0.1 * jax.random.normal(k3, (o,), jnp.float32)
        ones = jnp.ones((o,), jnp.float32)
        if is_up:
            got = conv_up(x, w, ones, b, "none", compute_dtype=jnp.float32)
            ref = _ref_conv_up(x, w, b)
        else:
            got = conv_down(x, w, ones, b, "none", pad_mode,
                            compute_dtype=jnp.float32)
            ref = _ref_conv_down(x, w, b, pad_mode)
        np.testing.assert_allclose(np.asarray(got), np.asarray(ref),
                                   rtol=2e-2, atol=2e-2,
                                   err_msg=f"self-test {name} mismatch")


if __name__ == "__main__":
    key = jax.random.PRNGKey(0)
    kt, kx, kp = jax.random.split(key, 3)

    _self_test(kt)

    in_ch, f = 3, 4
    # Spatial size must be >= 256: 8 stride-2 stages down to 1x1 at the bottleneck.
    x = jax.random.normal(kx, (1, in_ch, 256, 256), jnp.float32)
    params = init_params(kp, in_ch=in_ch, f=f)

    fwd = jax.jit(generator_forward)
    y = fwd(x, params)
    jax.block_until_ready(y)
    assert y.shape == (1, in_ch, 256, 256), y.shape
    assert y.dtype == jnp.float32
    print("KERNEL_OK")
</pallas_src>

<mosaic_0001>
module attributes {stable_mosaic.version = 11 : i64} {
  func.func @_tap_conv_kernel(%arg0: i32, %arg1: memref<8x33x32xbf16, #tpu.memory_space<vmem>>, %arg2: memref<2x32x8xbf16, #tpu.memory_space<vmem>>, %arg3: memref<1x256xf32, #tpu.memory_space<vmem>>, %arg4: memref<8x256xbf16, #tpu.memory_space<vmem>>) attributes {dimension_semantics = [#tpu.dimension_semantics<parallel>], iteration_bounds = array<i64: 2>, scalar_prefetch = 0 : i64, scratch_operands = 0 : i64, tpu.core_type = #tpu.core_type<tc>, window_params = [{transform_indices = @transform_0, window_bounds = array<i64: 8, 33, 32>}, {pipeline_mode = #tpu.pipeline_mode<synchronous>, transform_indices = @transform_1, window_bounds = array<i64: 2, 32, 8>}, {pipeline_mode = #tpu.pipeline_mode<synchronous>, transform_indices = @transform_2, window_bounds = array<i64: 1, 256>}, {transform_indices = @transform_3, window_bounds = array<i64: 8, 256>}]} {
    %cst = arith.constant 0.000000e+00 : f32
    %0 = vector.broadcast %cst : f32 to vector<256x8xf32>
    %c0 = arith.constant 0 : index
    %c0_0 = arith.constant 0 : index
    %c0_1 = arith.constant 0 : index
    %1 = vector.load %arg1[%c0, %c0_0, %c0_1] : memref<8x33x32xbf16, #tpu.memory_space<vmem>>, vector<8x32x32xbf16>
    %2 = vector.shape_cast %1 : vector<8x32x32xbf16> to vector<256x32xbf16>
    %c0_2 = arith.constant 0 : index
    %c0_3 = arith.constant 0 : index
    %c0_4 = arith.constant 0 : index
    %3 = vector.load %arg2[%c0_2, %c0_3, %c0_4] : memref<2x32x8xbf16, #tpu.memory_space<vmem>>, vector<1x32x8xbf16>
    %4 = vector.shape_cast %3 : vector<1x32x8xbf16> to vector<32x8xbf16>
    %cst_5 = arith.constant dense<0.000000e+00> : vector<256x8xf32>
    %5 = tpu.matmul %2, %4, %cst_5 {dimension_numbers = #tpu.dot_dimension_numbers<[1], [0], [0], [1], [0, 0, 1, 1], [], []>} : vector<256x32xbf16>, vector<32x8xbf16>, vector<256x8xf32> -> vector<256x8xf32>
    %6 = arith.addf %0, %5 : vector<256x8xf32>
    %c0_6 = arith.constant 0 : index
    %c1 = arith.constant 1 : index
    %c0_7 = arith.constant 0 : index
    %7 = vector.load %arg1[%c0_6, %c1, %c0_7] : memref<8x33x32xbf16, #tpu.memory_space<vmem>>, vector<8x32x32xbf16>
    %8 = vector.shape_cast %7 : vector<8x32x32xbf16> to vector<256x32xbf16>
    %c1_8 = arith.constant 1 : index
    %c0_9 = arith.constant 0 : index
    %c0_10 = arith.constant 0 : index
    %9 = vector.load %arg2[%c1_8, %c0_9, %c0_10] : memref<2x32x8xbf16, #tpu.memory_space<vmem>>, vector<1x32x8xbf16>
    %10 = vector.shape_cast %9 : vector<1x32x8xbf16> to vector<32x8xbf16>
    %cst_11 = arith.constant dense<0.000000e+00> : vector<256x8xf32>
    %11 = tpu.matmul %8, %10, %cst_11 {dimension_numbers = #tpu.dot_dimension_numbers<[1], [0], [0], [1], [0, 0, 1, 1], [], []>} : vector<256x32xbf16>, vector<32x8xbf16>, vector<256x8xf32> -> vector<256x8xf32>
    %12 = arith.addf %6, %11 : vector<256x8xf32>
    %13 = vector.shape_cast %12 : vector<256x8xf32> to vector<8x256xf32>
    %c0_12 = arith.constant 0 : index
    %c0_13 = arith.constant 0 : index
    %14 = vector.load %arg3[%c0_12, %c0_13] : memref<1x256xf32, #tpu.memory_space<vmem>>, vector<1x256xf32>
    %15 = vector.broadcast %14 : vector<1x256xf32> to vector<8x256xf32>
    %16 = arith.addf %13, %15 : vector<8x256xf32>
    %cst_14 = arith.constant 0.000000e+00 : f32
    %17 = vector.broadcast %cst_14 : f32 to vector<8x256xf32>
    %18 = arith.cmpf ogt, %16, %17 : vector<8x256xf32>
    %cst_15 = arith.constant 2.000000e-01 : f32
    %19 = vector.broadcast %cst_15 : f32 to vector<8x256xf32>
    %20 = arith.mulf %19, %16 : vector<8x256xf32>
    %21 = arith.select %18, %16, %20 : vector<8x256xi1>, vector<8x256xf32>
    %22 = arith.truncf %21 : vector<8x256xf32> to vector<8x256xbf16>
    %c0_16 = arith.constant 0 : index
    %c0_17 = arith.constant 0 : index
    %23 = vector.load %arg4[%c0_16, %c0_17] : memref<8x256xbf16, #tpu.memory_space<vmem>>, vector<8x256xbf16>
    tpu.vector_store %arg4[%c0_16, %c0_17], %22 {strides = array<i32>} : memref<8x256xbf16, #tpu.memory_space<vmem>>, vector<8x256xbf16>,
    return
  }
  func.func @transform_0(%arg0: i32) -> (i32, i32, i32) {
    %c0_i32 = arith.constant 0 : i32
    %c0_i32_0 = arith.constant 0 : i32
    %c0_i32_1 = arith.constant 0 : i32
    return %arg0, %c0_i32, %c0_i32_0 : i32, i32, i32
  }
  func.func @transform_1(%arg0: i32) -> (i32, i32, i32) {
    %c0_i32 = arith.constant 0 : i32
    %c0_i32_0 = arith.constant 0 : i32
    %c0_i32_1 = arith.constant 0 : i32
    %c0_i32_2 = arith.constant 0 : i32
    return %c0_i32, %c0_i32_0, %c0_i32_1 : i32, i32, i32
  }
  func.func @transform_2(%arg0: i32) -> (i32, i32) {
    %c0_i32 = arith.constant 0 : i32
    %c0_i32_0 = arith.constant 0 : i32
    %c0_i32_1 = arith.constant 0 : i32
    return %c0_i32, %c0_i32_0 : i32, i32
  }
  func.func @transform_3(%arg0: i32) -> (i32, i32) {
    %c0_i32 = arith.constant 0 : i32
    %c0_i32_0 = arith.constant 0 : i32
    return %arg0, %c0_i32 : i32, i32
  }
}

module attributes {stable_mosaic.version = 11 : i64} {
  func.func @_matmul_kernel(%arg0: i32, %arg1: memref<1024x48xf32, #tpu.memory_space<vmem>>, %arg2: memref<48x8xf32, #tpu.memory_space<vmem>>, %arg3: memref<1x8xf32, #tpu.memory_space<vmem>>, %arg4: memref<1024x8xf32, #tpu.memory_space<vmem>>) attributes {dimension_semantics = [#tpu.dimension_semantics<parallel>], iteration_bounds = array<i64: 1>, scalar_prefetch = 0 : i64, scratch_operands = 0 : i64, tpu.core_type = #tpu.core_type<tc>, window_params = [{transform_indices = @transform_0, window_bounds = array<i64: 1024, 48>}, {pipeline_mode = #tpu.pipeline_mode<synchronous>, transform_indices = @transform_1, window_bounds = array<i64: 48, 8>}, {pipeline_mode = #tpu.pipeline_mode<synchronous>, transform_indices = @transform_2, window_bounds = array<i64: 1, 8>}, {transform_indices = @transform_3, window_bounds = array<i64: 1024, 8>}]} {
    %c0 = arith.constant 0 : index
    %c0_0 = arith.constant 0 : index
    %0 = vector.load %arg1[%c0, %c0_0] : memref<1024x48xf32, #tpu.memory_space<vmem>>, vector<1024x48xf32>
    %c0_1 = arith.constant 0 : index
    %c0_2 = arith.constant 0 : index
    %1 = vector.load %arg2[%c0_1, %c0_2] : memref<48x8xf32, #tpu.memory_space<vmem>>, vector<48x8xf32>
    %cst = arith.constant dense<0.000000e+00> : vector<1024x8xf32>
    %2 = tpu.matmul %0, %1, %cst {dimension_numbers = #tpu.dot_dimension_numbers<[1], [0], [0], [1], [0, 0, 1, 1], [], []>} : vector<1024x48xf32>, vector<48x8xf32>, vector<1024x8xf32> -> vector<1024x8xf32>
    %c0_3 = arith.constant 0 : index
    %c0_4 = arith.constant 0 : index
    %3 = vector.load %arg3[%c0_3, %c0_4] : memref<1x8xf32, #tpu.memory_space<vmem>>, vector<1x8xf32>
    %4 = vector.broadcast %3 : vector<1x8xf32> to vector<1024x8xf32>
    %5 = arith.addf %2, %4 : vector<1024x8xf32>
    %c0_5 = arith.constant 0 : index
    %c0_6 = arith.constant 0 : index
    %6 = vector.load %arg4[%c0_5, %c0_6] : memref<1024x8xf32, #tpu.memory_space<vmem>>, vector<1024x8xf32>
    tpu.vector_store %arg4[%c0_5, %c0_6], %5 {strides = array<i32>} : memref<1024x8xf32, #tpu.memory_space<vmem>>, vector<1024x8xf32>,
    return
  }
  func.func @transform_0(%arg0: i32) -> (i32, i32) {
    %c0_i32 = arith.constant 0 : i32
    %c0_i32_0 = arith.constant 0 : i32
    return %arg0, %c0_i32 : i32, i32
  }
  func.func @transform_1(%arg0: i32) -> (i32, i32) {
    %c0_i32 = arith.constant 0 : i32
    %c0_i32_0 = arith.constant 0 : i32
    %c0_i32_1 = arith.constant 0 : i32
    return %c0_i32, %c0_i32_0 : i32, i32
  }
  func.func @transform_2(%arg0: i32) -> (i32, i32) {
    %c0_i32 = arith.constant 0 : i32
    %c0_i32_0 = arith.constant 0 : i32
    %c0_i32_1 = arith.constant 0 : i32
    return %c0_i32, %c0_i32_0 : i32, i32
  }
  func.func @transform_3(%arg0: i32) -> (i32, i32) {
    %c0_i32 = arith.constant 0 : i32
    %c0_i32_0 = arith.constant 0 : i32
    return %arg0, %c0_i32 : i32, i32
  }
}

</mosaic_0001>

<bundles_post_ra>
// kernel: tpu_custom_call.1
= control target key start
LH: loop header
LB: loop body
LE: loop exit
PB: predicated region body
PF: predicated region fallthrough
CT: control target
= control target key end

     0   :  { %vm155_vm0 = vcmask 392192   ;;  %vm1245_vm1 = vcmask 64512   ;;  %s3052_s1 = inlined_call_operand.vmem [shape: f32[48,8], index: 1, kind: input, shape index: {}]   ;;  %s3053_s0 = inlined_call_operand.vmem [shape: f32[1024,48], index: 0, kind: input, shape index: {}]   ;;  %s3054_s2 = inlined_call_operand.vmem [shape: f32[1,8], index: 2, kind: input, shape index: {}]   ;;  %s3055_s3 = inlined_call_operand.vmem [shape: f32[1024,8], index: 3, kind: output, shape index: {}]  }
   0x1   :  { %v147_v0 = vld [vmem:[%s3052_s1 + $0x28] sm:$0xff]  ;;  %v146_v1 = vld [vmem:[%s3052_s1 + $0x20] sm:$0xff]  ;;  %v145_v2 = vld [vmem:[%s3052_s1 + $0x18] sm:$0xff] }
   0x2   :  { %1641 = vmatprep.subr.mxu0 %v147_v0  ;;  %1845 = vmatprep.subr.mxu1 %v147_v0  ;;  %v144_v3 = vld [vmem:[%s3052_s1 + $0x10] sm:$0xff]  ;;  %v143_v4 = vld [vmem:[%s3052_s1 + $0x8] sm:$0xff]  ;;  %v142_v5 = vld [vmem:[%s3052_s1] sm:$0xff] }
   0x3   :  { %1642 = vmatpush3.msra.mxu0 %v147_v0  ;;  %1851 = vmatpush3.msra.mxu1 %v147_v0  ;;  %v14_v6 = vld [vmem:[%s3053_s0] sm:$0xff]  ;;  %v15_v8 = vld [vmem:[%s3053_s0 + $0x8] sm:$0xff]  ;;  %v16_v10 = vld [vmem:[%s3053_s0 + $0x10] sm:$0xff] }
   0x4   :  { %1643 = vmatprep.subr.mxu0 %v146_v1  ;;  %1846 = vmatprep.subr.mxu1 %v146_v1  ;;  %v78_v7 = vld [vmem:[%s3053_s0 + $0x200] sm:$0xff]  ;;  %v79_v9 = vld [vmem:[%s3053_s0 + $0x208] sm:$0xff]  ;;  %v80_v11 = vld [vmem:[%s3053_s0 + $0x210] sm:$0xff] }
   0x5   :  { %1644 = vmatpush3.msra.mxu0 %v146_v1  ;;  %1852 = vmatpush3.msra.mxu1 %v146_v1  ;;  %v17_v12 = vld [vmem:[%s3053_s0 + $0x18] sm:$0xff]  ;;  %v18_v14 = vld [vmem:[%s3053_s0 + $0x20] sm:$0xff]  ;;  %v19_v16 = vld [vmem:[%s3053_s0 + $0x28] sm:$0xff] }
   0x6   :  { %1645 = vmatprep.subr.mxu0 %v145_v2  ;;  %1847 = vmatprep.subr.mxu1 %v145_v2  ;;  %v81_v13 = vld [vmem:[%s3053_s0 + $0x218] sm:$0xff]  ;;  %v82_v15 = vld [vmem:[%s3053_s0 + $0x220] sm:$0xff]  ;;  %v83_v17 = vld [vmem:[%s3053_s0 + $0x228] sm:$0xff] }
   0x7   :  { %1646 = vmatpush3.msra.mxu0 %v145_v2  ;;  %1853 = vmatpush3.msra.mxu1 %v145_v2  ;;  %v20_v18 = vld [vmem:[%s3053_s0 + $0x30] sm:$0xff]  ;;  %v21_v20 = vld [vmem:[%s3053_s0 + $0x38] sm:$0xff]  ;;  %v22_v22 = vld [vmem:[%s3053_s0 + $0x40] sm:$0xff] }
   0x8   :  { %1647 = vmatprep.subr.mxu0 %v144_v3  ;;  %1848 = vmatprep.subr.mxu1 %v144_v3  ;;  %v84_v19 = vld [vmem:[%s3053_s0 + $0x230] sm:$0xff]  ;;  %v85_v21 = vld [vmem:[%s3053_s0 + $0x238] sm:$0xff]  ;;  %v86_v23 = vld [vmem:[%s3053_s0 + $0x240] sm:$0xff] }
   0x9   :  { %1648 = vmatpush3.msra.mxu0 %v144_v3  ;;  %1854 = vmatpush3.msra.mxu1 %v144_v3  ;;  %v23_v24 = vld [vmem:[%s3053_s0 + $0x48] sm:$0xff]  ;;  %v24_v26 = vld [vmem:[%s3053_s0 + $0x50] sm:$0xff]  ;;  %v25_v28 = vld [vmem:[%s3053_s0 + $0x58] sm:$0xff] }
   0xa   :  { %1649 = vmatprep.subr.mxu0 %v143_v4  ;;  %1849 = vmatprep.subr.mxu1 %v143_v4  ;;  %v87_v25 = vld [vmem:[%s3053_s0 + $0x248] sm:$0xff]  ;;  %v88_v27 = vld [vmem:[%s3053_s0 + $0x250] sm:$0xff]  ;;  %v89_v29 = vld [vmem:[%s3053_s0 + $0x258] sm:$0xff] }
   0xb   :  { %1650 = vmatpush3.msra.mxu0 %v143_v4  ;;  %1855 = vmatpush3.msra.mxu1 %v143_v4  ;;  %v26_v30 = vld [vmem:[%s3053_s0 + $0x60] sm:$0xff]  ;;  %v27_v32 = vld [vmem:[%s3053_s0 + $0x68] sm:$0xff]  ;;  %v28_v34 = vld [vmem:[%s3053_s0 + $0x70] sm:$0xff] }
   0xc   :  { %1651 = vmatprep.subr.mxu0 %v142_v5  ;;  %1850 = vmatprep.subr.mxu1 %v142_v5  ;;  %v90_v31 = vld [vmem:[%s3053_s0 + $0x260] sm:$0xff]  ;;  %v91_v33 = vld [vmem:[%s3053_s0 + $0x268] sm:$0xff]  ;;  %v92_v35 = vld [vmem:[%s3053_s0 + $0x270] sm:$0xff] }
   0xd   :  { %1652 = vmatpush3.msra.mxu0 %v142_v5  ;;  %1856 = vmatpush3.msra.mxu1 %v142_v5  ;;  %v29_v36 = vld [vmem:[%s3053_s0 + $0x78] sm:$0xff]  ;;  %v30_v38 = vld [vmem:[%s3053_s0 + $0x80] sm:$0xff]  ;;  %v31_v40 = vld [vmem:[%s3053_s0 + $0x88] sm:$0xff] }
   0xe   :  { %1653 = vmatprep.mubr.msk.f32.mxu0 %vm155_vm0, %v14_v6  ;;  %1749 = vmatprep.mubr.msk.f32.mxu1 %vm155_vm0, %v78_v7  ;;  %v93_v37 = vld [vmem:[%s3053_s0 + $0x278] sm:$0xff]  ;;  %v94_v39 = vld [vmem:[%s3053_s0 + $0x280] sm:$0xff]  ;;  %v95_v41 = vld [vmem:[%s3053_s0 + $0x288] sm:$0xff] }
   0xf   :  { %1654 = vmatmul.mubr.msk.f32.vlgmr.msra.gmra.mxu0 %vm155_vm0, %v15_v8  ;;  %1750 = vmatmul.mubr.msk.f32.vlgmr.msra.gmra.mxu1 %vm155_vm0, %v79_v9  ;;  %v32_v42 = vld [vmem:[%s3053_s0 + $0x90] sm:$0xff]  ;;  %v33_v44 = vld [vmem:[%s3053_s0 + $0x98] sm:$0xff]  ;;  %v34_v46 = vld [vmem:[%s3053_s0 + $0xa0] sm:$0xff] }
  0x10   :  { %1656 = vmatprep.mubr.msk.f32.mxu0 %vm155_vm0, %v16_v10  ;;  %1752 = vmatprep.mubr.msk.f32.mxu1 %vm155_vm0, %v80_v11  ;;  %v96_v43 = vld [vmem:[%s3053_s0 + $0x290] sm:$0xff]  ;;  %v97_v45 = vld [vmem:[%s3053_s0 + $0x298] sm:$0xff]  ;;  %v98_v47 = vld [vmem:[%s3053_s0 + $0x2a0] sm:$0xff] }
  0x11   :  { %v35_v48 = vld [vmem:[%s3053_s0 + $0xa8] sm:$0xff]  ;;  %v36_v50 = vld [vmem:[%s3053_s0 + $0xb0] sm:$0xff]  ;;  %v37_v52 = vld [vmem:[%s3053_s0 + $0xb8] sm:$0xff] }
  0x12   :  { %v99_v49 = vld [vmem:[%s3053_s0 + $0x2a8] sm:$0xff]  ;;  %v100_v51 = vld [vmem:[%s3053_s0 + $0x2b0] sm:$0xff]  ;;  %v101_v53 = vld [vmem:[%s3053_s0 + $0x2b8] sm:$0xff] }
  0x13   :  { %1657 = vmatmul.mubr.msk.f32.gmra.mxu0 %vm155_vm0, %v17_v12  ;;  %1753 = vmatmul.mubr.msk.f32.gmra.mxu1 %vm155_vm0, %v81_v13  ;;  %v38_v54 = vld [vmem:[%s3053_s0 + $0xc0] sm:$0xff]  ;;  %v39_v56 = vld [vmem:[%s3053_s0 + $0xc8] sm:$0xff]  ;;  %v40_v58 = vld [vmem:[%s3053_s0 + $0xd0] sm:$0xff] }
  0x14   :  { %1659 = vmatprep.mubr.msk.f32.mxu0 %vm155_vm0, %v18_v14  ;;  %1755 = vmatprep.mubr.msk.f32.mxu1 %vm155_vm0, %v82_v15  ;;  %v102_v55 = vld [vmem:[%s3053_s0 + $0x2c0] sm:$0xff]  ;;  %v103_v57 = vld [vmem:[%s3053_s0 + $0x2c8] sm:$0xff]  ;;  %v104_v59 = vld [vmem:[%s3053_s0 + $0x2d0] sm:$0xff] }
  0x15   :  { %v41_v60 = vld [vmem:[%s3053_s0 + $0xd8] sm:$0xff]  ;;  %v42_v62 = vld [vmem:[%s3053_s0 + $0xe0] sm:$0xff]  ;;  %v43_v0 = vld [vmem:[%s3053_s0 + $0xe8] sm:$0xff] }
  0x16   :  { %v105_v61 = vld [vmem:[%s3053_s0 + $0x2d8] sm:$0xff]  ;;  %v106_v63 = vld [vmem:[%s3053_s0 + $0x2e0] sm:$0xff]  ;;  %v107_v1 = vld [vmem:[%s3053_s0 + $0x2e8] sm:$0xff] }
  0x17   :  { %1660 = vmatmul.mubr.msk.f32.gmra.mxu0 %vm155_vm0, %v19_v16  ;;  %1756 = vmatmul.mubr.msk.f32.gmra.mxu1 %vm155_vm0, %v83_v17  ;;  %v44_v2 = vld [vmem:[%s3053_s0 + $0xf0] sm:$0xff]  ;;  %v45_v4 = vld [vmem:[%s3053_s0 + $0xf8] sm:$0xff]  ;;  %v46_v6 = vld [vmem:[%s3053_s0 + $0x100] sm:$0xff] }
  0x18   :  { %1662 = vmatprep.mubr.msk.f32.mxu0 %vm155_vm0, %v20_v18  ;;  %1758 = vmatprep.mubr.msk.f32.mxu1 %vm155_vm0, %v84_v19  ;;  %v108_v3 = vld [vmem:[%s3053_s0 + $0x2f0] sm:$0xff]  ;;  %v109_v5 = vld [vmem:[%s3053_s0 + $0x2f8] sm:$0xff]  ;;  %v110_v7 = vld [vmem:[%s3053_s0 + $0x300] sm:$0xff] }
  0x19   :  { %v47_v8 = vld [vmem:[%s3053_s0 + $0x108] sm:$0xff]  ;;  %v48_v10 = vld [vmem:[%s3053_s0 + $0x110] sm:$0xff]  ;;  %v49_v12 = vld [vmem:[%s3053_s0 + $0x118] sm:$0xff] }
  0x1a   :  { %v111_v9 = vld [vmem:[%s3053_s0 + $0x308] sm:$0xff]  ;;  %v112_v11 = vld [vmem:[%s3053_s0 + $0x310] sm:$0xff]  ;;  %v113_v13 = vld [vmem:[%s3053_s0 + $0x318] sm:$0xff] }
  0x1b   :  { %1663 = vmatmul.mubr.msk.f32.gmra.mxu0 %vm155_vm0, %v21_v20  ;;  %1759 = vmatmul.mubr.msk.f32.gmra.mxu1 %vm155_vm0, %v85_v21  ;;  %v50_v14 = vld [vmem:[%s3053_s0 + $0x120] sm:$0xff]  ;;  %v51_v16 = vld [vmem:[%s3053_s0 + $0x128] sm:$0xff]  ;;  %v52_v18 = vld [vmem:[%s3053_s0 + $0x130] sm:$0xff] }
  0x1c   :  { %1665 = vmatprep.mubr.msk.f32.mxu0 %vm155_vm0, %v22_v22  ;;  %1761 = vmatprep.mubr.msk.f32.mxu1 %vm155_vm0, %v86_v23  ;;  %v114_v15 = vld [vmem:[%s3053_s0 + $0x320] sm:$0xff]  ;;  %v115_v17 = vld [vmem:[%s3053_s0 + $0x328] sm:$0xff]  ;;  %v116_v19 = vld [vmem:[%s3053_s0 + $0x330] sm:$0xff] }
  0x1d   :  { %v53_v20 = vld [vmem:[%s3053_s0 + $0x138] sm:$0xff]  ;;  %v54_v22 = vld [vmem:[%s3053_s0 + $0x140] sm:$0xff] }
  0x1e   :  { %v117_v21 = vld [vmem:[%s3053_s0 + $0x338] sm:$0xff]  ;;  %v118_v23 = vld [vmem:[%s3053_s0 + $0x340] sm:$0xff] }
  0x1f   :  { %1666 = vmatmul.mubr.msk.f32.gmra.mxu0 %vm155_vm0, %v23_v24  ;;  %1762 = vmatmul.mubr.msk.f32.gmra.mxu1 %vm155_vm0, %v87_v25  ;;  %v55_v24 = vld [vmem:[%s3053_s0 + $0x148] sm:$0xff] }
  0x20   :  { %1668 = vmatprep.mubr.msk.f32.mxu0 %vm155_vm0, %v24_v26  ;;  %1764 = vmatprep.mubr.msk.f32.mxu1 %vm155_vm0, %v88_v27  ;;  %v119_v25 = vld [vmem:[%s3053_s0 + $0x348] sm:$0xff]  ;;  %v56_v26 = vld [vmem:[%s3053_s0 + $0x150] sm:$0xff] }
  0x21   :  { %v120_v27 = vld [vmem:[%s3053_s0 + $0x350] sm:$0xff] }
  0x23   :  { %1669 = vmatmul.mubr.msk.f32.gmra.mxu0 %vm155_vm0, %v25_v28  ;;  %1765 = vmatmul.mubr.msk.f32.gmra.mxu1 %vm155_vm0, %v89_v29  ;;  %v57_v28 = vld [vmem:[%s3053_s0 + $0x158] sm:$0xff] }
  0x24   :  { %1671 = vmatprep.mubr.msk.f32.mxu0 %vm155_vm0, %v26_v30  ;;  %1767 = vmatprep.mubr.msk.f32.mxu1 %vm155_vm0, %v90_v31  ;;  %v121_v29 = vld [vmem:[%s3053_s0 + $0x358] sm:$0xff]  ;;  %v58_v30 = vld [vmem:[%s3053_s0 + $0x160] sm:$0xff] }
  0x25   :  { %v122_v31 = vld [vmem:[%s3053_s0 + $0x360] sm:$0xff] }
  0x27   :  { %1672 = vmatmul.mubr.msk.f32.gmra.mxu0 %vm155_vm0, %v27_v32  ;;  %1768 = vmatmul.mubr.msk.f32.gmra.mxu1 %vm155_vm0, %v91_v33  ;;  %v59_v32 = vld [vmem:[%s3053_s0 + $0x168] sm:$0xff] }
  0x28   :  { %1674 = vmatprep.mubr.msk.f32.mxu0 %vm155_vm0, %v28_v34  ;;  %1770 = vmatprep.mubr.msk.f32.mxu1 %vm155_vm0, %v92_v35  ;;  %v123_v33 = vld [vmem:[%s3053_s0 + $0x368] sm:$0xff]  ;;  %v60_v34 = vld [vmem:[%s3053_s0 + $0x170] sm:$0xff] }
  0x29   :  { %v124_v35 = vld [vmem:[%s3053_s0 + $0x370] sm:$0xff] }
  0x2b   :  { %1675 = vmatmul.mubr.msk.f32.gmra.mxu0 %vm155_vm0, %v29_v36  ;;  %1771 = vmatmul.mubr.msk.f32.gmra.mxu1 %vm155_vm0, %v93_v37  ;;  %v61_v36 = vld [vmem:[%s3053_s0 + $0x178] sm:$0xff] }
  0x2c   :  { %1677 = vmatprep.mubr.msk.f32.mxu0 %vm155_vm0, %v30_v38  ;;  %1773 = vmatprep.mubr.msk.f32.mxu1 %vm155_vm0, %v94_v39  ;;  %v125_v37 = vld [vmem:[%s3053_s0 + $0x378] sm:$0xff]  ;;  %v62_v38 = vld [vmem:[%s3053_s0 + $0x180] sm:$0xff] }
  0x2d   :  { %v126_v39 = vld [vmem:[%s3053_s0 + $0x380] sm:$0xff] }
  0x2f   :  { %1678 = vmatmul.mubr.msk.f32.gmra.mxu0 %vm155_vm0, %v31_v40  ;;  %1774 = vmatmul.mubr.msk.f32.gmra.mxu1 %vm155_vm0, %v95_v41  ;;  %v63_v40 = vld [vmem:[%s3053_s0 + $0x188] sm:$0xff] }
  0x30   :  { %1680 = vmatprep.mubr.msk.f32.mxu0 %vm155_vm0, %v32_v42  ;;  %1776 = vmatprep.mubr.msk.f32.mxu1 %vm155_vm0, %v96_v43  ;;  %v127_v41 = vld [vmem:[%s3053_s0 + $0x388] sm:$0xff]  ;;  %v64_v42 = vld [vmem:[%s3053_s0 + $0x190] sm:$0xff] }
  0x31   :  { %v128_v43 = vld [vmem:[%s3053_s0 + $0x390] sm:$0xff] }
  0x33   :  { %1681 = vmatmul.mubr.msk.f32.gmra.mxu0 %vm155_vm0, %v33_v44  ;;  %1777 = vmatmul.mubr.msk.f32.gmra.mxu1 %vm155_vm0, %v97_v45  ;;  %v65_v44 = vld [vmem:[%s3053_s0 + $0x198] sm:$0xff] }
  0x34   :  { %1683 = vmatprep.mubr.msk.f32.mxu0 %vm155_vm0, %v34_v46  ;;  %1779 = vmatprep.mubr.msk.f32.mxu1 %vm155_vm0, %v98_v47  ;;  %v129_v45 = vld [vmem:[%s3053_s0 + $0x398] sm:$0xff]  ;;  %v66_v46 = vld [vmem:[%s3053_s0 + $0x1a0] sm:$0xff] }
  0x35   :  { %v130_v47 = vld [vmem:[%s3053_s0 + $0x3a0] sm:$0xff] }
  0x37   :  { %1684 = vmatmul.mubr.msk.f32.gmra.mxu0 %vm155_vm0, %v35_v48  ;;  %1780 = vmatmul.mubr.msk.f32.gmra.mxu1 %vm155_vm0, %v99_v49  ;;  %v67_v48 = vld [vmem:[%s3053_s0 + $0x1a8] sm:$0xff] }
  0x38   :  { %1686 = vmatprep.mubr.msk.f32.mxu0 %vm155_vm0, %v36_v50  ;;  %1782 = vmatprep.mubr.msk.f32.mxu1 %vm155_vm0, %v100_v51  ;;  %v131_v49 = vld [vmem:[%s3053_s0 + $0x3a8] sm:$0xff]  ;;  %v68_v50 = vld [vmem:[%s3053_s0 + $0x1b0] sm:$0xff] }
  0x39   :  { %v132_v51 = vld [vmem:[%s3053_s0 + $0x3b0] sm:$0xff] }
  0x3b   :  { %1687 = vmatmul.mubr.msk.f32.gmra.mxu0 %vm155_vm0, %v37_v52  ;;  %1783 = vmatmul.mubr.msk.f32.gmra.mxu1 %vm155_vm0, %v101_v53  ;;  %v69_v52 = vld [vmem:[%s3053_s0 + $0x1b8] sm:$0xff] }
  0x3c   :  { %1689 = vmatprep.mubr.msk.f32.mxu0 %vm155_vm0, %v38_v54  ;;  %1785 = vmatprep.mubr.msk.f32.mxu1 %vm155_vm0, %v102_v55  ;;  %v133_v53 = vld [vmem:[%s3053_s0 + $0x3b8] sm:$0xff]  ;;  %v70_v54 = vld [vmem:[%s3053_s0 + $0x1c0] sm:$0xff] }
  0x3d   :  { %v134_v55 = vld [vmem:[%s3053_s0 + $0x3c0] sm:$0xff] }
  0x3f   :  { %1690 = vmatmul.mubr.msk.f32.gmra.mxu0 %vm155_vm0, %v39_v56  ;;  %1786 = vmatmul.mubr.msk.f32.gmra.mxu1 %vm155_vm0, %v103_v57  ;;  %v71_v56 = vld [vmem:[%s3053_s0 + $0x1c8] sm:$0xff] }
  0x40   :  { %1692 = vmatprep.mubr.msk.f32.mxu0 %vm155_vm0, %v40_v58  ;;  %1788 = vmatprep.mubr.msk.f32.mxu1 %vm155_vm0, %v104_v59  ;;  %v135_v57 = vld [vmem:[%s3053_s0 + $0x3c8] sm:$0xff]  ;;  %v72_v58 = vld [vmem:[%s3053_s0 + $0x1d0] sm:$0xff] }
  0x41   :  { %v136_v59 = vld [vmem:[%s3053_s0 + $0x3d0] sm:$0xff] }
  0x43   :  { %1693 = vmatmul.mubr.msk.f32.gmra.mxu0 %vm155_vm0, %v41_v60  ;;  %1789 = vmatmul.mubr.msk.f32.gmra.mxu1 %vm155_vm0, %v105_v61  ;;  %v73_v60 = vld [vmem:[%s3053_s0 + $0x1d8] sm:$0xff] }
  0x44   :  { %1695 = vmatprep.mubr.msk.f32.mxu0 %vm155_vm0, %v42_v62  ;;  %1791 = vmatprep.mubr.msk.f32.mxu1 %vm155_vm0, %v106_v63  ;;  %v137_v61 = vld [vmem:[%s3053_s0 + $0x3d8] sm:$0xff]  ;;  %v74_v62 = vld [vmem:[%s3053_s0 + $0x1e0] sm:$0xff] }
  0x45   :  { %v138_v63 = vld [vmem:[%s3053_s0 + $0x3e0] sm:$0xff] }
  0x47   :  { %1696 = vmatmul.mubr.msk.f32.gmra.mxu0 %vm155_vm0, %v43_v0  ;;  %1792 = vmatmul.mubr.msk.f32.gmra.mxu1 %vm155_vm0, %v107_v1  ;;  %v75_v0 = vld [vmem:[%s3053_s0 + $0x1e8] sm:$0xff] }
  0x48   :  { %1698 = vmatprep.mubr.msk.f32.mxu0 %vm155_vm0, %v44_v2  ;;  %1794 = vmatprep.mubr.msk.f32.mxu1 %vm155_vm0, %v108_v3  ;;  %v139_v1 = vld [vmem:[%s3053_s0 + $0x3e8] sm:$0xff]  ;;  %v76_v2 = vld [vmem:[%s3053_s0 + $0x1f0] sm:$0xff] }
  0x49   :  { %v140_v3 = vld [vmem:[%s3053_s0 + $0x3f0] sm:$0xff] }
  0x4b   :  { %1699 = vmatmul.mubr.msk.f32.gmra.mxu0 %vm155_vm0, %v45_v4  ;;  %1795 = vmatmul.mubr.msk.f32.gmra.mxu1 %vm155_vm0, %v109_v5  ;;  %v77_v4 = vld [vmem:[%s3053_s0 + $0x1f8] sm:$0xff] }
  0x4c   :  { %1701 = vmatprep.mubr.msk.f32.mxu0 %vm155_vm0, %v46_v6  ;;  %1797 = vmatprep.mubr.msk.f32.mxu1 %vm155_vm0, %v110_v7  ;;  %v141_v5 = vld [vmem:[%s3053_s0 + $0x3f8] sm:$0xff]  ;;  %v2410_v6 = vld [vmem:[%s3054_s2] ss:$0 sm:$0xff] }
  0x4f   :  { %1702 = vmatmul.mubr.msk.f32.gmra.mxu0 %vm155_vm0, %v47_v8  ;;  %1798 = vmatmul.mubr.msk.f32.gmra.mxu1 %vm155_vm0, %v111_v9 }
  0x50   :  { %1704 = vmatprep.mubr.msk.f32.mxu0 %vm155_vm0, %v48_v10  ;;  %1800 = vmatprep.mubr.msk.f32.mxu1 %vm155_vm0, %v112_v11 }
  0x53   :  { %1705 = vmatmul.mubr.msk.f32.gmra.mxu0 %vm155_vm0, %v49_v12  ;;  %1801 = vmatmul.mubr.msk.f32.gmra.mxu1 %vm155_vm0, %v113_v13 }
  0x54   :  { %1707 = vmatprep.mubr.msk.f32.mxu0 %vm155_vm0, %v50_v14  ;;  %1803 = vmatprep.mubr.msk.f32.mxu1 %vm155_vm0, %v114_v15 }
  0x57   :  { %1708 = vmatmul.mubr.msk.f32.gmra.mxu0 %vm155_vm0, %v51_v16  ;;  %1804 = vmatmul.mubr.msk.f32.gmra.mxu1 %vm155_vm0, %v115_v17 }
  0x58   :  { %1710 = vmatprep.mubr.msk.f32.mxu0 %vm155_vm0, %v52_v18  ;;  %1806 = vmatprep.mubr.msk.f32.mxu1 %vm155_vm0, %v116_v19 }
  0x5b   :  { %1711 = vmatmul.mubr.msk.f32.gmra.mxu0 %vm155_vm0, %v53_v20  ;;  %1807 = vmatmul.mubr.msk.f32.gmra.mxu1 %vm155_vm0, %v117_v21 }
  0x5c   :  { %1713 = vmatprep.mubr.msk.f32.mxu0 %vm155_vm0, %v54_v22  ;;  %1809 = vmatprep.mubr.msk.f32.mxu1 %vm155_vm0, %v118_v23 }
  0x5f   :  { %1714 = vmatmul.mubr.msk.f32.gmra.mxu0 %vm155_vm0, %v55_v24  ;;  %1810 = vmatmul.mubr.msk.f32.gmra.mxu1 %vm155_vm0, %v119_v25 }
  0x60   :  { %1716 = vmatprep.mubr.msk.f32.mxu0 %vm155_vm0, %v56_v26  ;;  %1812 = vmatprep.mubr.msk.f32.mxu1 %vm155_vm0, %v120_v27 }
  0x63   :  { %1717 = vmatmul.mubr.msk.f32.gmra.mxu0 %vm155_vm0, %v57_v28  ;;  %1813 = vmatmul.mubr.msk.f32.gmra.mxu1 %vm155_vm0, %v121_v29 }
  0x64   :  { %1719 = vmatprep.mubr.msk.f32.mxu0 %vm155_vm0, %v58_v30  ;;  %1815 = vmatprep.mubr.msk.f32.mxu1 %vm155_vm0, %v122_v31 }
  0x67   :  { %1720 = vmatmul.mubr.msk.f32.gmra.mxu0 %vm155_vm0, %v59_v32  ;;  %1816 = vmatmul.mubr.msk.f32.gmra.mxu1 %vm155_vm0, %v123_v33 }
  0x68   :  { %1722 = vmatprep.mubr.msk.f32.mxu0 %vm155_vm0, %v60_v34  ;;  %1818 = vmatprep.mubr.msk.f32.mxu1 %vm155_vm0, %v124_v35 }
  0x6b   :  { %1723 = vmatmul.mubr.msk.f32.gmra.mxu0 %vm155_vm0, %v61_v36  ;;  %1819 = vmatmul.mubr.msk.f32.gmra.mxu1 %vm155_vm0, %v125_v37 }
  0x6c   :  { %1725 = vmatprep.mubr.msk.f32.mxu0 %vm155_vm0, %v62_v38  ;;  %1821 = vmatprep.mubr.msk.f32.mxu1 %vm155_vm0, %v126_v39 }
  0x6f   :  { %1726 = vmatmul.mubr.msk.f32.gmra.mxu0 %vm155_vm0, %v63_v40  ;;  %1822 = vmatmul.mubr.msk.f32.gmra.mxu1 %vm155_vm0, %v127_v41 }
  0x70   :  { %1728 = vmatprep.mubr.msk.f32.mxu0 %vm155_vm0, %v64_v42  ;;  %1824 = vmatprep.mubr.msk.f32.mxu1 %vm155_vm0, %v128_v43 }
  0x73   :  { %1729 = vmatmul.mubr.msk.f32.gmra.mxu0 %vm155_vm0, %v65_v44  ;;  %1825 = vmatmul.mubr.msk.f32.gmra.mxu1 %vm155_vm0, %v129_v45 }
  0x74   :  { %1731 = vmatprep.mubr.msk.f32.mxu0 %vm155_vm0, %v66_v46  ;;  %1827 = vmatprep.mubr.msk.f32.mxu1 %vm155_vm0, %v130_v47 }
  0x77   :  { %1732 = vmatmul.mubr.msk.f32.gmra.mxu0 %vm155_vm0, %v67_v48  ;;  %1828 = vmatmul.mubr.msk.f32.gmra.mxu1 %vm155_vm0, %v131_v49 }
  0x78   :  { %1734 = vmatprep.mubr.msk.f32.mxu0 %vm155_vm0, %v68_v50  ;;  %1830 = vmatprep.mubr.msk.f32.mxu1 %vm155_vm0, %v132_v51 }
  0x7b   :  { %1735 = vmatmul.mubr.msk.f32.gmra.mxu0 %vm155_vm0, %v69_v52  ;;  %1831 = vmatmul.mubr.msk.f32.gmra.mxu1 %vm155_vm0, %v133_v53 }
  0x7c   :  { %1737 = vmatprep.mubr.msk.f32.mxu0 %vm155_vm0, %v70_v54  ;;  %1833 = vmatprep.mubr.msk.f32.mxu1 %vm155_vm0, %v134_v55 }
  0x7f   :  { %1738 = vmatmul.mubr.msk.f32.gmra.mxu0 %vm155_vm0, %v71_v56  ;;  %1834 = vmatmul.mubr.msk.f32.gmra.mxu1 %vm155_vm0, %v135_v57 }
  0x80   :  { %1740 = vmatprep.mubr.msk.f32.mxu0 %vm155_vm0, %v72_v58  ;;  %1836 = vmatprep.mubr.msk.f32.mxu1 %vm155_vm0, %v136_v59 }
  0x83   :  { %1741 = vmatmul.mubr.msk.f32.gmra.mxu0 %vm155_vm0, %v73_v60  ;;  %1837 = vmatmul.mubr.msk.f32.gmra.mxu1 %vm155_vm0, %v137_v61 }
  0x84   :  { %1743 = vmatprep.mubr.msk.f32.mxu0 %vm155_vm0, %v74_v62  ;;  %1839 = vmatprep.mubr.msk.f32.mxu1 %vm155_vm0, %v138_v63 }
  0x87   :  { %1744 = vmatmul.mubr.msk.f32.gmra.mxu0 %vm155_vm0, %v75_v0  ;;  %1840 = vmatmul.mubr.msk.f32.gmra.mxu1 %vm155_vm0, %v139_v1 }
  0x88   :  { %1746 = vmatprep.mubr.msk.f32.mxu0 %vm155_vm0, %v76_v2  ;;  %1842 = vmatprep.mubr.msk.f32.mxu1 %vm155_vm0, %v140_v3 }
  0x8b   :  { %1747 = vmatmul.mubr.msk.f32.gmra.mxu0 %vm155_vm0, %v77_v4  ;;  %1843 = vmatmul.mubr.msk.f32.gmra.mxu1 %vm155_vm0, %v141_v5 }
  0xcf   :  { %v1655_v7 = vpop.f32.mrf.mxu0  ;;  %v1751_v8 = vpop.f32.mrf.mxu1 }
  0xd0   :  { %v612_v9 = vadd.f32 %v1655_v7, %v2410_v6  ;;  %v932_v10 = vadd.f32 %v1751_v8, %v2410_v6 }
  0xd1   :  { %v606_v11 = vpop.f32.mrf.mxu0  ;;  %v926_v12 = vpop.f32.mrf.mxu1 }
  0xd2   :  { %1247 = vst.msk [vmem:[%s3055_s3 + $0x8] sm:$0xff] %vm1245_vm1, %v612_v9  ;;  %1311 = vst.msk [vmem:[%s3055_s3 + $0x208] sm:$0xff] %vm1245_vm1, %v932_v10  ;;  %v607_v13 = vadd.f32 %v2410_v6, %v606_v11  ;;  %v927_v14 = vadd.f32 %v2410_v6, %v926_v12 }
  0xd3   :  { %v1658_v15 = vpop.f32.mrf.mxu0  ;;  %v1754_v16 = vpop.f32.mrf.mxu1 }
  0xd4   :  { %1246 = vst.msk [vmem:[%s3055_s3] sm:$0xff] %vm1245_vm1, %v607_v13  ;;  %1310 = vst.msk [vmem:[%s3055_s3 + $0x200] sm:$0xff] %vm1245_vm1, %v927_v14  ;;  %v622_v17 = vadd.f32 %v1658_v15, %v2410_v6  ;;  %v942_v18 = vadd.f32 %v1754_v16, %v2410_v6 }
  0xd5   :  { %v616_v19 = vpop.f32.mrf.mxu0  ;;  %v936_v20 = vpop.f32.mrf.mxu1 }
  0xd6   :  { %1249 = vst.msk [vmem:[%s3055_s3 + $0x18] sm:$0xff] %vm1245_vm1, %v622_v17  ;;  %1313 = vst.msk [vmem:[%s3055_s3 + $0x218] sm:$0xff] %vm1245_vm1, %v942_v18  ;;  %v617_v21 = vadd.f32 %v2410_v6, %v616_v19  ;;  %v937_v22 = vadd.f32 %v2410_v6, %v936_v20 }
  0xd7   :  { %v1661_v23 = vpop.f32.mrf.mxu0  ;;  %v1757_v24 = vpop.f32.mrf.mxu1 }
  0xd8   :  { %1248 = vst.msk [vmem:[%s3055_s3 + $0x10] sm:$0xff] %vm1245_vm1, %v617_v21  ;;  %1312 = vst.msk [vmem:[%s3055_s3 + $0x210] sm:$0xff] %vm1245_vm1, %v937_v22  ;;  %v632_v25 = vadd.f32 %v1661_v23, %v2410_v6  ;;  %v952_v26 = vadd.f32 %v1757_v24, %v2410_v6 }
  0xd9   :  { %v626_v27 = vpop.f32.mrf.mxu0  ;;  %v946_v28 = vpop.f32.mrf.mxu1 }
  0xda   :  { %1251 = vst.msk [vmem:[%s3055_s3 + $0x28] sm:$0xff] %vm1245_vm1, %v632_v25  ;;  %1315 = vst.msk [vmem:[%s3055_s3 + $0x228] sm:$0xff] %vm1245_vm1, %v952_v26  ;;  %v627_v29 = vadd.f32 %v2410_v6, %v626_v27  ;;  %v947_v30 = vadd.f32 %v2410_v6, %v946_v28 }
  0xdb   :  { %v1664_v31 = vpop.f32.mrf.mxu0  ;;  %v1760_v32 = vpop.f32.mrf.mxu1 }
  0xdc   :  { %1250 = vst.msk [vmem:[%s3055_s3 + $0x20] sm:$0xff] %vm1245_vm1, %v627_v29  ;;  %1314 = vst.msk [vmem:[%s3055_s3 + $0x220] sm:$0xff] %vm1245_vm1, %v947_v30  ;;  %v642_v33 = vadd.f32 %v1664_v31, %v2410_v6  ;;  %v962_v34 = vadd.f32 %v1760_v32, %v2410_v6 }
  0xdd   :  { %v636_v35 = vpop.f32.mrf.mxu0  ;;  %v956_v36 = vpop.f32.mrf.mxu1 }
  0xde   :  { %1253 = vst.msk [vmem:[%s3055_s3 + $0x38] sm:$0xff] %vm1245_vm1, %v642_v33  ;;  %1317 = vst.msk [vmem:[%s3055_s3 + $0x238] sm:$0xff] %vm1245_vm1, %v962_v34  ;;  %v637_v37 = vadd.f32 %v2410_v6, %v636_v35  ;;  %v957_v38 = vadd.f32 %v2410_v6, %v956_v36 }
  0xdf   :  { %v1667_v39 = vpop.f32.mrf.mxu0  ;;  %v1763_v40 = vpop.f32.mrf.mxu1 }
  0xe0   :  { %1252 = vst.msk [vmem:[%s3055_s3 + $0x30] sm:$0xff] %vm1245_vm1, %v637_v37  ;;  %1316 = vst.msk [vmem:[%s3055_s3 + $0x230] sm:$0xff] %vm1245_vm1, %v957_v38  ;;  %v652_v41 = vadd.f32 %v1667_v39, %v2410_v6  ;;  %v972_v42 = vadd.f32 %v1763_v40, %v2410_v6 }
  0xe1   :  { %v646_v43 = vpop.f32.mrf.mxu0  ;;  %v966_v44 = vpop.f32.mrf.mxu1 }
  0xe2   :  { %1255 = vst.msk [vmem:[%s3055_s3 + $0x48] sm:$0xff] %vm1245_vm1, %v652_v41  ;;  %1319 = vst.msk [vmem:[%s3055_s3 + $0x248] sm:$0xff] %vm1245_vm1, %v972_v42  ;;  %v647_v45 = vadd.f32 %v2410_v6, %v646_v43  ;;  %v967_v46 = vadd.f32 %v2410_v6, %v966_v44 }
  0xe3   :  { %v1670_v47 = vpop.f32.mrf.mxu0  ;;  %v1766_v48 = vpop.f32.mrf.mxu1 }
  0xe4   :  { %1254 = vst.msk [vmem:[%s3055_s3 + $0x40] sm:$0xff] %vm1245_vm1, %v647_v45  ;;  %1318 = vst.msk [vmem:[%s3055_s3 + $0x240] sm:$0xff] %vm1245_vm1, %v967_v46  ;;  %v662_v49 = vadd.f32 %v1670_v47, %v2410_v6  ;;  %v982_v50 = vadd.f32 %v1766_v48, %v2410_v6 }
  0xe5   :  { %v656_v51 = vpop.f32.mrf.mxu0  ;;  %v976_v52 = vpop.f32.mrf.mxu1 }
  0xe6   :  { %1257 = vst.msk [vmem:[%s3055_s3 + $0x58] sm:$0xff] %vm1245_vm1, %v662_v49  ;;  %1321 = vst.msk [vmem:[%s3055_s3 + $0x258] sm:$0xff] %vm1245_vm1, %v982_v50  ;;  %v657_v53 = vadd.f32 %v2410_v6, %v656_v51  ;;  %v977_v54 = vadd.f32 %v2410_v6, %v976_v52 }
  0xe7   :  { %v1673_v55 = vpop.f32.mrf.mxu0  ;;  %v1769_v56 = vpop.f32.mrf.mxu1 }
  0xe8   :  { %1256 = vst.msk [vmem:[%s3055_s3 + $0x50] sm:$0xff] %vm1245_vm1, %v657_v53  ;;  %1320 = vst.msk [vmem:[%s3055_s3 + $0x250] sm:$0xff] %vm1245_vm1, %v977_v54  ;;  %v672_v57 = vadd.f32 %v1673_v55, %v2410_v6  ;;  %v992_v58 = vadd.f32 %v1769_v56, %v2410_v6 }
  0xe9   :  { %v666_v59 = vpop.f32.mrf.mxu0  ;;  %v986_v60 = vpop.f32.mrf.mxu1 }
  0xea   :  { %1259 = vst.msk [vmem:[%s3055_s3 + $0x68] sm:$0xff] %vm1245_vm1, %v672_v57  ;;  %1323 = vst.msk [vmem:[%s3055_s3 + $0x268] sm:$0xff] %vm1245_vm1, %v992_v58  ;;  %v667_v61 = vadd.f32 %v2410_v6, %v666_v59  ;;  %v987_v62 = vadd.f32 %v2410_v6, %v986_v60 }
  0xeb   :  { %v1676_v63 = vpop.f32.mrf.mxu0  ;;  %v1772_v0 = vpop.f32.mrf.mxu1 }
  0xec   :  { %1258 = vst.msk [vmem:[%s3055_s3 + $0x60] sm:$0xff] %vm1245_vm1, %v667_v61  ;;  %1322 = vst.msk [vmem:[%s3055_s3 + $0x260] sm:$0xff] %vm1245_vm1, %v987_v62  ;;  %v682_v1 = vadd.f32 %v1676_v63, %v2410_v6  ;;  %v1002_v2 = vadd.f32 %v1772_v0, %v2410_v6 }
  0xed   :  { %v676_v3 = vpop.f32.mrf.mxu0  ;;  %v996_v4 = vpop.f32.mrf.mxu1 }
  0xee   :  { %1261 = vst.msk [vmem:[%s3055_s3 + $0x78] sm:$0xff] %vm1245_vm1, %v682_v1  ;;  %1325 = vst.msk [vmem:[%s3055_s3 + $0x278] sm:$0xff] %vm1245_vm1, %v1002_v2  ;;  %v677_v5 = vadd.f32 %v2410_v6, %v676_v3  ;;  %v997_v7 = vadd.f32 %v2410_v6, %v996_v4 }
  0xef   :  { %v1679_v8 = vpop.f32.mrf.mxu0  ;;  %v1775_v9 = vpop.f32.mrf.mxu1 }
  0xf0   :  { %1260 = vst.msk [vmem:[%s3055_s3 + $0x70] sm:$0xff] %vm1245_vm1, %v677_v5  ;;  %1324 = vst.msk [vmem:[%s3055_s3 + $0x270] sm:$0xff] %vm1245_vm1, %v997_v7  ;;  %v692_v10 = vadd.f32 %v1679_v8, %v2410_v6  ;;  %v1012_v11 = vadd.f32 %v1775_v9, %v2410_v6 }
  0xf1   :  { %v686_v12 = vpop.f32.mrf.mxu0  ;;  %v1006_v13 = vpop.f32.mrf.mxu1 }
  0xf2   :  { %1263 = vst.msk [vmem:[%s3055_s3 + $0x88] sm:$0xff] %vm1245_vm1, %v692_v10  ;;  %1327 = vst.msk [vmem:[%s3055_s3 + $0x288] sm:$0xff] %vm1245_vm1, %v1012_v11  ;;  %v687_v14 = vadd.f32 %v2410_v6, %v686_v12  ;;  %v1007_v15 = vadd.f32 %v2410_v6, %v1006_v13 }
  0xf3   :  { %v1682_v16 = vpop.f32.mrf.mxu0  ;;  %v1778_v17 = vpop.f32.mrf.mxu1 }
  0xf4   :  { %1262 = vst.msk [vmem:[%s3055_s3 + $0x80] sm:$0xff] %vm1245_vm1, %v687_v14  ;;  %1326 = vst.msk [vmem:[%s3055_s3 + $0x280] sm:$0xff] %vm1245_vm1, %v1007_v15  ;;  %v702_v18 = vadd.f32 %v1682_v16, %v2410_v6  ;;  %v1022_v19 = vadd.f32 %v1778_v17, %v2410_v6 }
  0xf5   :  { %v696_v20 = vpop.f32.mrf.mxu0  ;;  %v1016_v21 = vpop.f32.mrf.mxu1 }
  0xf6   :  { %1265 = vst.msk [vmem:[%s3055_s3 + $0x98] sm:$0xff] %vm1245_vm1, %v702_v18  ;;  %1329 = vst.msk [vmem:[%s3055_s3 + $0x298] sm:$0xff] %vm1245_vm1, %v1022_v19  ;;  %v697_v22 = vadd.f32 %v2410_v6, %v696_v20  ;;  %v1017_v23 = vadd.f32 %v2410_v6, %v1016_v21 }
  0xf7   :  { %v1685_v24 = vpop.f32.mrf.mxu0  ;;  %v1781_v25 = vpop.f32.mrf.mxu1 }
  0xf8   :  { %1264 = vst.msk [vmem:[%s3055_s3 + $0x90] sm:$0xff] %vm1245_vm1, %v697_v22  ;;  %1328 = vst.msk [vmem:[%s3055_s3 + $0x290] sm:$0xff] %vm1245_vm1, %v1017_v23  ;;  %v712_v26 = vadd.f32 %v1685_v24, %v2410_v6  ;;  %v1032_v27 = vadd.f32 %v1781_v25, %v2410_v6 }
  0xf9   :  { %v706_v28 = vpop.f32.mrf.mxu0  ;;  %v1026_v29 = vpop.f32.mrf.mxu1 }
  0xfa   :  { %1267 = vst.msk [vmem:[%s3055_s3 + $0xa8] sm:$0xff] %vm1245_vm1, %v712_v26  ;;  %1331 = vst.msk [vmem:[%s3055_s3 + $0x2a8] sm:$0xff] %vm1245_vm1, %v1032_v27  ;;  %v707_v30 = vadd.f32 %v2410_v6, %v706_v28  ;;  %v1027_v31 = vadd.f32 %v2410_v6, %v1026_v29 }
  0xfb   :  { %v1688_v32 = vpop.f32.mrf.mxu0  ;;  %v1784_v33 = vpop.f32.mrf.mxu1 }
  0xfc   :  { %1266 = vst.msk [vmem:[%s3055_s3 + $0xa0] sm:$0xff] %vm1245_vm1, %v707_v30  ;;  %1330 = vst.msk [vmem:[%s3055_s3 + $0x2a0] sm:$0xff] %vm1245_vm1, %v1027_v31  ;;  %v722_v34 = vadd.f32 %v1688_v32, %v2410_v6  ;;  %v1042_v35 = vadd.f32 %v1784_v33, %v2410_v6 }
  0xfd   :  { %v716_v36 = vpop.f32.mrf.mxu0  ;;  %v1036_v37 = vpop.f32.mrf.mxu1 }
  0xfe   :  { %1269 = vst.msk [vmem:[%s3055_s3 + $0xb8] sm:$0xff] %vm1245_vm1, %v722_v34  ;;  %1333 = vst.msk [vmem:[%s3055_s3 + $0x2b8] sm:$0xff] %vm1245_vm1, %v1042_v35  ;;  %v717_v38 = vadd.f32 %v2410_v6, %v716_v36  ;;  %v1037_v39 = vadd.f32 %v2410_v6, %v1036_v37 }
  0xff   :  { %v1691_v40 = vpop.f32.mrf.mxu0  ;;  %v1787_v41 = vpop.f32.mrf.mxu1 }
 0x100   :  { %1268 = vst.msk [vmem:[%s3055_s3 + $0xb0] sm:$0xff] %vm1245_vm1, %v717_v38  ;;  %1332 = vst.msk [vmem:[%s3055_s3 + $0x2b0] sm:$0xff] %vm1245_vm1, %v1037_v39  ;;  %v732_v42 = vadd.f32 %v1691_v40, %v2410_v6  ;;  %v1052_v43 = vadd.f32 %v1787_v41, %v2410_v6 }
 0x101   :  { %v726_v44 = vpop.f32.mrf.mxu0  ;;  %v1046_v45 = vpop.f32.mrf.mxu1 }
 0x102   :  { %1271 = vst.msk [vmem:[%s3055_s3 + $0xc8] sm:$0xff] %vm1245_vm1, %v732_v42  ;;  %1335 = vst.msk [vmem:[%s3055_s3 + $0x2c8] sm:$0xff] %vm1245_vm1, %v1052_v43  ;;  %v727_v46 = vadd.f32 %v2410_v6, %v726_v44  ;;  %v1047_v47 = vadd.f32 %v2410_v6, %v1046_v45 }
 0x103   :  { %v1694_v48 = vpop.f32.mrf.mxu0  ;;  %v1790_v49 = vpop.f32.mrf.mxu1 }
 0x104   :  { %1270 = vst.msk [vmem:[%s3055_s3 + $0xc0] sm:$0xff] %vm1245_vm1, %v727_v46  ;;  %1334 = vst.msk [vmem:[%s3055_s3 + $0x2c0] sm:$0xff] %vm1245_vm1, %v1047_v47  ;;  %v742_v50 = vadd.f32 %v1694_v48, %v2410_v6  ;;  %v1062_v51 = vadd.f32 %v1790_v49, %v2410_v6 }
 0x105   :  { %v736_v52 = vpop.f32.mrf.mxu0  ;;  %v1056_v53 = vpop.f32.mrf.mxu1 }
 0x106   :  { %1273 = vst.msk [vmem:[%s3055_s3 + $0xd8] sm:$0xff] %vm1245_vm1, %v742_v50  ;;  %1337 = vst.msk [vmem:[%s3055_s3 + $0x2d8] sm:$0xff] %vm1245_vm1, %v1062_v51  ;;  %v737_v54 = vadd.f32 %v2410_v6, %v736_v52  ;;  %v1057_v55 = vadd.f32 %v2410_v6, %v1056_v53 }
 0x107   :  { %v1697_v56 = vpop.f32.mrf.mxu0  ;;  %v1793_v57 = vpop.f32.mrf.mxu1 }
 0x108   :  { %1272 = vst.msk [vmem:[%s3055_s3 + $0xd0] sm:$0xff] %vm1245_vm1, %v737_v54  ;;  %1336 = vst.msk [vmem:[%s3055_s3 + $0x2d0] sm:$0xff] %vm1245_vm1, %v1057_v55  ;;  %v752_v58 = vadd.f32 %v1697_v56, %v2410_v6  ;;  %v1072_v59 = vadd.f32 %v1793_v57, %v2410_v6 }
 0x109   :  { %v746_v60 = vpop.f32.mrf.mxu0  ;;  %v1066_v61 = vpop.f32.mrf.mxu1 }
 0x10a   :  { %1275 = vst.msk [vmem:[%s3055_s3 + $0xe8] sm:$0xff] %vm1245_vm1, %v752_v58  ;;  %1339 = vst.msk [vmem:[%s3055_s3 + $0x2e8] sm:$0xff] %vm1245_vm1, %v1072_v59  ;;  %v747_v62 = vadd.f32 %v2410_v6, %v746_v60  ;;  %v1067_v63 = vadd.f32 %v2410_v6, %v1066_v61 }
 0x10b   :  { %v1700_v0 = vpop.f32.mrf.mxu0  ;;  %v1796_v1 = vpop.f32.mrf.mxu1 }
 0x10c   :  { %1274 = vst.msk [vmem:[%s3055_s3 + $0xe0] sm:$0xff] %vm1245_vm1, %v747_v62  ;;  %1338 = vst.msk [vmem:[%s3055_s3 + $0x2e0] sm:$0xff] %vm1245_vm1, %v1067_v63  ;;  %v762_v2 = vadd.f32 %v1700_v0, %v2410_v6  ;;  %v1082_v3 = vadd.f32 %v1796_v1, %v2410_v6 }
 0x10d   :  { %v756_v4 = vpop.f32.mrf.mxu0  ;;  %v1076_v5 = vpop.f32.mrf.mxu1 }
 0x10e   :  { %1277 = vst.msk [vmem:[%s3055_s3 + $0xf8] sm:$0xff] %vm1245_vm1, %v762_v2  ;;  %1341 = vst.msk [vmem:[%s3055_s3 + $0x2f8] sm:$0xff] %vm1245_vm1, %v1082_v3  ;;  %v757_v7 = vadd.f32 %v2410_v6, %v756_v4  ;;  %v1077_v8 = vadd.f32 %v2410_v6, %v1076_v5 }
 0x10f   :  { %v1703_v9 = vpop.f32.mrf.mxu0  ;;  %v1799_v10 = vpop.f32.mrf.mxu1 }
 0x110   :  { %1276 = vst.msk [vmem:[%s3055_s3 + $0xf0] sm:$0xff] %vm1245_vm1, %v757_v7  ;;  %1340 = vst.msk [vmem:[%s3055_s3 + $0x2f0] sm:$0xff] %vm1245_vm1, %v1077_v8  ;;  %v772_v11 = vadd.f32 %v1703_v9, %v2410_v6  ;;  %v1092_v12 = vadd.f32 %v1799_v10, %v2410_v6 }
 0x111   :  { %v766_v13 = vpop.f32.mrf.mxu0  ;;  %v1086_v14 = vpop.f32.mrf.mxu1 }
 0x112   :  { %1279 = vst.msk [vmem:[%s3055_s3 + $0x108] sm:$0xff] %vm1245_vm1, %v772_v11  ;;  %1343 = vst.msk [vmem:[%s3055_s3 + $0x308] sm:$0xff] %vm1245_vm1, %v1092_v12  ;;  %v767_v15 = vadd.f32 %v2410_v6, %v766_v13  ;;  %v1087_v16 = vadd.f32 %v2410_v6, %v1086_v14 }
 0x113   :  { %v1706_v17 = vpop.f32.mrf.mxu0  ;;  %v1802_v18 = vpop.f32.mrf.mxu1 }
 0x114   :  { %1278 = vst.msk [vmem:[%s3055_s3 + $0x100] sm:$0xff] %vm1245_vm1, %v767_v15  ;;  %1342 = vst.msk [vmem:[%s3055_s3 + $0x300] sm:$0xff] %vm1245_vm1, %v1087_v16  ;;  %v782_v19 = vadd.f32 %v1706_v17, %v2410_v6  ;;  %v1102_v20 = vadd.f32 %v1802_v18, %v2410_v6 }
 0x115   :  { %v776_v21 = vpop.f32.mrf.mxu0  ;;  %v1096_v22 = vpop.f32.mrf.mxu1 }
 0x116   :  { %1281 = vst.msk [vmem:[%s3055_s3 + $0x118] sm:$0xff] %vm1245_vm1, %v782_v19  ;;  %1345 = vst.msk [vmem:[%s3055_s3 + $0x318] sm:$0xff] %vm1245_vm1, %v1102_v20  ;;  %v777_v23 = vadd.f32 %v2410_v6, %v776_v21  ;;  %v1097_v24 = vadd.f32 %v2410_v6, %v1096_v22 }
 0x117   :  { %v1709_v25 = vpop.f32.mrf.mxu0  ;;  %v1805_v26 = vpop.f32.mrf.mxu1 }
 0x118   :  { %1280 = vst.msk [vmem:[%s3055_s3 + $0x110] sm:$0xff] %vm1245_vm1, %v777_v23  ;;  %1344 = vst.msk [vmem:[%s3055_s3 + $0x310] sm:$0xff] %vm1245_vm1, %v1097_v24  ;;  %v792_v27 = vadd.f32 %v1709_v25, %v2410_v6  ;;  %v1112_v28 = vadd.f32 %v1805_v26, %v2410_v6 }
 0x119   :  { %v786_v29 = vpop.f32.mrf.mxu0  ;;  %v1106_v30 = vpop.f32.mrf.mxu1 }
 0x11a   :  { %1283 = vst.msk [vmem:[%s3055_s3 + $0x128] sm:$0xff] %vm1245_vm1, %v792_v27  ;;  %1347 = vst.msk [vmem:[%s3055_s3 + $0x328] sm:$0xff] %vm1245_vm1, %v1112_v28  ;;  %v787_v31 = vadd.f32 %v2410_v6, %v786_v29  ;;  %v1107_v32 = vadd.f32 %v2410_v6, %v1106_v30 }
 0x11b   :  { %v1712_v33 = vpop.f32.mrf.mxu0  ;;  %v1808_v34 = vpop.f32.mrf.mxu1 }
 0x11c   :  { %1282 = vst.msk [vmem:[%s3055_s3 + $0x120] sm:$0xff] %vm1245_vm1, %v787_v31  ;;  %1346 = vst.msk [vmem:[%s3055_s3 + $0x320] sm:$0xff] %vm1245_vm1, %v1107_v32  ;;  %v802_v35 = vadd.f32 %v1712_v33, %v2410_v6  ;;  %v1122_v36 = vadd.f32 %v1808_v34, %v2410_v6 }
 0x11d   :  { %v796_v37 = vpop.f32.mrf.mxu0  ;;  %v1116_v38 = vpop.f32.mrf.mxu1 }
 0x11e   :  { %1285 = vst.msk [vmem:[%s3055_s3 + $0x138] sm:$0xff] %vm1245_vm1, %v802_v35  ;;  %1349 = vst.msk [vmem:[%s3055_s3 + $0x338] sm:$0xff] %vm1245_vm1, %v1122_v36  ;;  %v797_v39 = vadd.f32 %v2410_v6, %v796_v37  ;;  %v1117_v40 = vadd.f32 %v2410_v6, %v1116_v38 }
 0x11f   :  { %v1715_v41 = vpop.f32.mrf.mxu0  ;;  %v1811_v42 = vpop.f32.mrf.mxu1 }
 0x120   :  { %1284 = vst.msk [vmem:[%s3055_s3 + $0x130] sm:$0xff] %vm1245_vm1, %v797_v39  ;;  %1348 = vst.msk [vmem:[%s3055_s3 + $0x330] sm:$0xff] %vm1245_vm1, %v1117_v40  ;;  %v812_v43 = vadd.f32 %v1715_v41, %v2410_v6  ;;  %v1132_v44 = vadd.f32 %v1811_v42, %v2410_v6 }
 0x121   :  { %v806_v45 = vpop.f32.mrf.mxu0  ;;  %v1126_v46 = vpop.f32.mrf.mxu1 }
 0x122   :  { %1287 = vst.msk [vmem:[%s3055_s3 + $0x148] sm:$0xff] %vm1245_vm1, %v812_v43  ;;  %1351 = vst.msk [vmem:[%s3055_s3 + $0x348] sm:$0xff] %vm1245_vm1, %v1132_v44  ;;  %v807_v47 = vadd.f32 %v2410_v6, %v806_v45  ;;  %v1127_v48 = vadd.f32 %v2410_v6, %v1126_v46 }
 0x123   :  { %v1718_v49 = vpop.f32.mrf.mxu0  ;;  %v1814_v50 = vpop.f32.mrf.mxu1 }
 0x124   :  { %1286 = vst.msk [vmem:[%s3055_s3 + $0x140] sm:$0xff] %vm1245_vm1, %v807_v47  ;;  %1350 = vst.msk [vmem:[%s3055_s3 + $0x340] sm:$0xff] %vm1245_vm1, %v1127_v48  ;;  %v822_v51 = vadd.f32 %v1718_v49, %v2410_v6  ;;  %v1142_v52 = vadd.f32 %v1814_v50, %v2410_v6 }
 0x125   :  { %v816_v53 = vpop.f32.mrf.mxu0  ;;  %v1136_v54 = vpop.f32.mrf.mxu1 }
 0x126   :  { %1289 = vst.msk [vmem:[%s3055_s3 + $0x158] sm:$0xff] %vm1245_vm1, %v822_v51  ;;  %1353 = vst.msk [vmem:[%s3055_s3 + $0x358] sm:$0xff] %vm1245_vm1, %v1142_v52  ;;  %v817_v55 = vadd.f32 %v2410_v6, %v816_v53  ;;  %v1137_v56 = vadd.f32 %v2410_v6, %v1136_v54 }
 0x127   :  { %v1721_v57 = vpop.f32.mrf.mxu0  ;;  %v1817_v58 = vpop.f32.mrf.mxu1 }
 0x128   :  { %1288 = vst.msk [vmem:[%s3055_s3 + $0x150] sm:$0xff] %vm1245_vm1, %v817_v55  ;;  %1352 = vst.msk [vmem:[%s3055_s3 + $0x350] sm:$0xff] %vm1245_vm1, %v1137_v56  ;;  %v832_v59 = vadd.f32 %v1721_v57, %v2410_v6  ;;  %v1152_v60 = vadd.f32 %v1817_v58, %v2410_v6 }
 0x129   :  { %v826_v61 = vpop.f32.mrf.mxu0  ;;  %v1146_v62 = vpop.f32.mrf.mxu1 }
 0x12a   :  { %1291 = vst.msk [vmem:[%s3055_s3 + $0x168] sm:$0xff] %vm1245_vm1, %v832_v59  ;;  %1355 = vst.msk [vmem:[%s3055_s3 + $0x368] sm:$0xff] %vm1245_vm1, %v1152_v60  ;;  %v827_v63 = vadd.f32 %v2410_v6, %v826_v61  ;;  %v1147_v0 = vadd.f32 %v2410_v6, %v1146_v62 }
 0x12b   :  { %v1724_v1 = vpop.f32.mrf.mxu0  ;;  %v1820_v2 = vpop.f32.mrf.mxu1 }
 0x12c   :  { %1290 = vst.msk [vmem:[%s3055_s3 + $0x160] sm:$0xff] %vm1245_vm1, %v827_v63  ;;  %1354 = vst.msk [vmem:[%s3055_s3 + $0x360] sm:$0xff] %vm1245_vm1, %v1147_v0  ;;  %v842_v3 = vadd.f32 %v1724_v1, %v2410_v6  ;;  %v1162_v4 = vadd.f32 %v1820_v2, %v2410_v6 }
 0x12d   :  { %v836_v5 = vpop.f32.mrf.mxu0  ;;  %v1156_v7 = vpop.f32.mrf.mxu1 }
 0x12e   :  { %1293 = vst.msk [vmem:[%s3055_s3 + $0x178] sm:$0xff] %vm1245_vm1, %v842_v3  ;;  %1357 = vst.msk [vmem:[%s3055_s3 + $0x378] sm:$0xff] %vm1245_vm1, %v1162_v4  ;;  %v837_v8 = vadd.f32 %v2410_v6, %v836_v5  ;;  %v1157_v9 = vadd.f32 %v2410_v6, %v1156_v7 }
 0x12f   :  { %v1727_v10 = vpop.f32.mrf.mxu0  ;;  %v1823_v11 = vpop.f32.mrf.mxu1 }
 0x130   :  { %1292 = vst.msk [vmem:[%s3055_s3 + $0x170] sm:$0xff] %vm1245_vm1, %v837_v8  ;;  %1356 = vst.msk [vmem:[%s3055_s3 + $0x370] sm:$0xff] %vm1245_vm1, %v1157_v9  ;;  %v852_v12 = vadd.f32 %v1727_v10, %v2410_v6  ;;  %v1172_v13 = vadd.f32 %v1823_v11, %v2410_v6 }
 0x131   :  { %v846_v14 = vpop.f32.mrf.mxu0  ;;  %v1166_v15 = vpop.f32.mrf.mxu1 }
 0x132   :  { %1295 = vst.msk [vmem:[%s3055_s3 + $0x188] sm:$0xff] %vm1245_vm1, %v852_v12  ;;  %1359 = vst.msk [vmem:[%s3055_s3 + $0x388] sm:$0xff] %vm1245_vm1, %v1172_v13  ;;  %v847_v16 = vadd.f32 %v2410_v6, %v846_v14  ;;  %v1167_v17 = vadd.f32 %v2410_v6, %v1166_v15 }
 0x133   :  { %v1730_v18 = vpop.f32.mrf.mxu0  ;;  %v1826_v19 = vpop.f32.mrf.mxu1 }
 0x134   :  { %1294 = vst.msk [vmem:[%s3055_s3 + $0x180] sm:$0xff] %vm1245_vm1, %v847_v16  ;;  %1358 = vst.msk [vmem:[%s3055_s3 + $0x380] sm:$0xff] %vm1245_vm1, %v1167_v17  ;;  %v862_v20 = vadd.f32 %v1730_v18, %v2410_v6  ;;  %v1182_v21 = vadd.f32 %v1826_v19, %v2410_v6 }
 0x135   :  { %v856_v22 = vpop.f32.mrf.mxu0  ;;  %v1176_v23 = vpop.f32.mrf.mxu1 }
 0x136   :  { %1297 = vst.msk [vmem:[%s3055_s3 + $0x198] sm:$0xff] %vm1245_vm1, %v862_v20  ;;  %1361 = vst.msk [vmem:[%s3055_s3 + $0x398] sm:$0xff] %vm1245_vm1, %v1182_v21  ;;  %v857_v24 = vadd.f32 %v2410_v6, %v856_v22  ;;  %v1177_v25 = vadd.f32 %v2410_v6, %v1176_v23 }
 0x137   :  { %v1733_v26 = vpop.f32.mrf.mxu0  ;;  %v1829_v27 = vpop.f32.mrf.mxu1 }
 0x138   :  { %1296 = vst.msk [vmem:[%s3055_s3 + $0x190] sm:$0xff] %vm1245_vm1, %v857_v24  ;;  %1360 = vst.msk [vmem:[%s3055_s3 + $0x390] sm:$0xff] %vm1245_vm1, %v1177_v25  ;;  %v872_v28 = vadd.f32 %v1733_v26, %v2410_v6  ;;  %v1192_v29 = vadd.f32 %v1829_v27, %v2410_v6 }
 0x139   :  { %v866_v30 = vpop.f32.mrf.mxu0  ;;  %v1186_v31 = vpop.f32.mrf.mxu1 }
 0x13a   :  { %1299 = vst.msk [vmem:[%s3055_s3 + $0x1a8] sm:$0xff] %vm1245_vm1, %v872_v28  ;;  %1363 = vst.msk [vmem:[%s3055_s3 + $0x3a8] sm:$0xff] %vm1245_vm1, %v1192_v29  ;;  %v867_v32 = vadd.f32 %v2410_v6, %v866_v30  ;;  %v1187_v33 = vadd.f32 %v2410_v6, %v1186_v31 }
 0x13b   :  { %v1736_v34 = vpop.f32.mrf.mxu0  ;;  %v1832_v35 = vpop.f32.mrf.mxu1 }
 0x13c   :  { %1298 = vst.msk [vmem:[%s3055_s3 + $0x1a0] sm:$0xff] %vm1245_vm1, %v867_v32  ;;  %1362 = vst.msk [vmem:[%s3055_s3 + $0x3a0] sm:$0xff] %vm1245_vm1, %v1187_v33  ;;  %v882_v36 = vadd.f32 %v1736_v34, %v2410_v6  ;;  %v1202_v37 = vadd.f32 %v1832_v35, %v2410_v6 }
 0x13d   :  { %v876_v38 = vpop.f32.mrf.mxu0  ;;  %v1196_v39 = vpop.f32.mrf.mxu1 }
 0x13e   :  { %1301 = vst.msk [vmem:[%s3055_s3 + $0x1b8] sm:$0xff] %vm1245_vm1, %v882_v36  ;;  %1365 = vst.msk [vmem:[%s3055_s3 + $0x3b8] sm:$0xff] %vm1245_vm1, %v1202_v37  ;;  %v877_v40 = vadd.f32 %v2410_v6, %v876_v38  ;;  %v1197_v41 = vadd.f32 %v2410_v6, %v1196_v39 }
 0x13f   :  { %v1739_v42 = vpop.f32.mrf.mxu0  ;;  %v1835_v43 = vpop.f32.mrf.mxu1 }
 0x140   :  { %1300 = vst.msk [vmem:[%s3055_s3 + $0x1b0] sm:$0xff] %vm1245_vm1, %v877_v40  ;;  %1364 = vst.msk [vmem:[%s3055_s3 + $0x3b0] sm:$0xff] %vm1245_vm1, %v1197_v41  ;;  %v892_v44 = vadd.f32 %v1739_v42, %v2410_v6  ;;  %v1212_v45 = vadd.f32 %v1835_v43, %v2410_v6 }
 0x141   :  { %v886_v46 = vpop.f32.mrf.mxu0  ;;  %v1206_v47 = vpop.f32.mrf.mxu1 }
 0x142   :  { %1303 = vst.msk [vmem:[%s3055_s3 + $0x1c8] sm:$0xff] %vm1245_vm1, %v892_v44  ;;  %1367 = vst.msk [vmem:[%s3055_s3 + $0x3c8] sm:$0xff] %vm1245_vm1, %v1212_v45  ;;  %v887_v48 = vadd.f32 %v2410_v6, %v886_v46  ;;  %v1207_v49 = vadd.f32 %v2410_v6, %v1206_v47 }
 0x143   :  { %v1742_v50 = vpop.f32.mrf.mxu0  ;;  %v1838_v51 = vpop.f32.mrf.mxu1 }
 0x144   :  { %1302 = vst.msk [vmem:[%s3055_s3 + $0x1c0] sm:$0xff] %vm1245_vm1, %v887_v48  ;;  %1366 = vst.msk [vmem:[%s3055_s3 + $0x3c0] sm:$0xff] %vm1245_vm1, %v1207_v49  ;;  %v902_v52 = vadd.f32 %v1742_v50, %v2410_v6  ;;  %v1222_v53 = vadd.f32 %v1838_v51, %v2410_v6 }
 0x145   :  { %v896_v54 = vpop.f32.mrf.mxu0  ;;  %v1216_v55 = vpop.f32.mrf.mxu1 }
 0x146   :  { %1305 = vst.msk [vmem:[%s3055_s3 + $0x1d8] sm:$0xff] %vm1245_vm1, %v902_v52  ;;  %1369 = vst.msk [vmem:[%s3055_s3 + $0x3d8] sm:$0xff] %vm1245_vm1, %v1222_v53  ;;  %v897_v56 = vadd.f32 %v2410_v6, %v896_v54  ;;  %v1217_v57 = vadd.f32 %v2410_v6, %v1216_v55 }
 0x147   :  { %v1745_v58 = vpop.f32.mrf.mxu0  ;;  %v1841_v59 = vpop.f32.mrf.mxu1 }
 0x148   :  { %1304 = vst.msk [vmem:[%s3055_s3 + $0x1d0] sm:$0xff] %vm1245_vm1, %v897_v56  ;;  %1368 = vst.msk [vmem:[%s3055_s3 + $0x3d0] sm:$0xff] %vm1245_vm1, %v1217_v57  ;;  %v912_v60 = vadd.f32 %v1745_v58, %v2410_v6  ;;  %v1232_v61 = vadd.f32 %v1841_v59, %v2410_v6 }
 0x149   :  { %v906_v62 = vpop.f32.mrf.mxu0  ;;  %v1226_v63 = vpop.f32.mrf.mxu1 }
 0x14a   :  { %1307 = vst.msk [vmem:[%s3055_s3 + $0x1e8] sm:$0xff] %vm1245_vm1, %v912_v60  ;;  %1371 = vst.msk [vmem:[%s3055_s3 + $0x3e8] sm:$0xff] %vm1245_vm1, %v1232_v61  ;;  %v907_v0 = vadd.f32 %v2410_v6, %v906_v62  ;;  %v1227_v1 = vadd.f32 %v2410_v6, %v1226_v63 }
 0x14b   :  { %v1748_v2 = vpop.f32.mrf.mxu0  ;;  %v1844_v3 = vpop.f32.mrf.mxu1 }
 0x14c   :  { %1306 = vst.msk [vmem:[%s3055_s3 + $0x1e0] sm:$0xff] %vm1245_vm1, %v907_v0  ;;  %1370 = vst.msk [vmem:[%s3055_s3 + $0x3e0] sm:$0xff] %vm1245_vm1, %v1227_v1  ;;  %v922_v4 = vadd.f32 %v1748_v2, %v2410_v6  ;;  %v1242_v5 = vadd.f32 %v1844_v3, %v2410_v6 }
 0x14d   :  { %v916_v7 = vpop.f32.mrf.mxu0  ;;  %v1236_v8 = vpop.f32.mrf.mxu1 }
 0x14e   :  { %1309 = vst.msk [vmem:[%s3055_s3 + $0x1f8] sm:$0xff] %vm1245_vm1, %v922_v4  ;;  %1373 = vst.msk [vmem:[%s3055_s3 + $0x3f8] sm:$0xff] %vm1245_vm1, %v1242_v5  ;;  %v917_v9 = vadd.f32 %v2410_v6, %v916_v7  ;;  %v1237_v10 = vadd.f32 %v2410_v6, %v1236_v8 }
 0x150   :  { %1308 = vst.msk [vmem:[%s3055_s3 + $0x1f0] sm:$0xff] %vm1245_vm1, %v917_v9  ;;  %1372 = vst.msk [vmem:[%s3055_s3 + $0x3f0] sm:$0xff] %vm1245_vm1, %v1237_v10 }

</bundles_post_ra>
